<compile_context>
chip_gen: v7x
topology: tpu7x:2x2x1
jax: 0.10.0
libtpu: 0.0.40
codegen_flags: <defaults>
</compile_context>

<pallas_src>
import jax
import jax.numpy as jnp
from jax.experimental import pallas as pl
from jax.experimental.pallas import tpu as pltpu


# ----------------------------- Pallas kernels ------------------------------ #

def conv3x3_stats_kernel(x_mid_ref, x_top_ref, x_bot_ref, w_ref,
                         y_ref, sum_ref, sq_ref,
                         xpad_ref, col_ref):
    """3x3 conv (padding=1) on one (batch, H-tile) block + fused BN statistics.

    x_mid_ref : (1, TH, W, Cin)   current H-tile (NHWC)
    x_top_ref : (1, 1, W, Cin)    row just above the tile (clamped at image top)
    x_bot_ref : (1, 1, W, Cin)    row just below the tile (clamped at bottom)
    w_ref     : (9*Cin, Cout)     weights, rows ordered (dy, dx, cin)
    y_ref     : (1, Cout, TH*W)   conv output, channel-major (lane-dense)
    sum_ref   : (1, 1, Cout)      per-batch running channel sum   (over H-tiles)
    sq_ref    : (1, 1, Cout)      per-batch running channel sum^2 (over H-tiles)
    xpad_ref  : (TH+2, W+2, Cin)  VMEM scratch: zero-padded input tile
    col_ref   : (TH*W, 9*Cin)     VMEM scratch: im2col patch matrix
    """
    _, TH, W, Cin = x_mid_ref.shape
    h = pl.program_id(1)
    num_h = pl.num_programs(1)

    # ---- assemble the zero-padded (TH+2, W+2, Cin) tile in VMEM ----------- #
    xpad_ref[...] = jnp.zeros_like(xpad_ref)
    xpad_ref[1:TH + 1, 1:W + 1, :] = x_mid_ref[0]

    @pl.when(h > 0)                      # halo row above (zero at image top)
    def _():
        xpad_ref[0:1, 1:W + 1, :] = x_top_ref[0]

    @pl.when(h < num_h - 1)              # halo row below (zero at image bottom)
    def _():
        xpad_ref[TH + 1:TH + 2, 1:W + 1, :] = x_bot_ref[0]

    # ---- im2col: build (TH*W, 9*Cin) once per tile in VMEM ----------------- #
    k = 0
    for dy in range(3):
        for dx in range(3):
            tap = xpad_ref[dy:dy + TH, dx:dx + W, :].reshape(TH * W, Cin)
            col_ref[:, k * Cin:(k + 1) * Cin] = tap
            k += 1

    # ---- single MXU matmul, K = 9*Cin --------------------------------------- #
    r = jnp.dot(col_ref[...], w_ref[...],
                preferred_element_type=jnp.float32)           # (TH*W, Cout)

    # ---- fused BatchNorm statistics (accumulated over the H-tile axis) ------ #
    # Single-pass E[x^2] - E[x]^2 in f32; fine at these activation scales.
    @pl.when(h == 0)
    def _():
        sum_ref[...] = jnp.zeros_like(sum_ref)
        sq_ref[...] = jnp.zeros_like(sq_ref)

    sum_ref[...] += jnp.sum(r, axis=0)[None, None, :]
    sq_ref[...] += jnp.sum(r * r, axis=0)[None, None, :]

    # ---- write conv output channel-major (lane-dense 2-D transpose) -------- #
    y_ref[0, :, :] = r.T                                      # (Cout, TH*W)


def bn_relu_nchw_kernel(y_ref, scale_ref, shift_ref, o_ref):
    """Apply y*scale + shift, ReLU, and write the block directly in NCHW.

    y_ref     : (1, Cout, TH*W)   channel-major conv output tile
    scale_ref : (Cout, 1)
    shift_ref : (Cout, 1)
    o_ref     : (1, Cout, TH, W)  NCHW output block
    """
    TH, W = o_ref.shape[2], o_ref.shape[3]
    z = jnp.maximum(y_ref[0] * scale_ref[...] + shift_ref[...], 0.0)  # (Cout, TH*W)
    for th in range(TH):                      # static, unrolled row-slab stores
        o_ref[0, :, th, :] = z[:, th * W:(th + 1) * W]


# ------------------------------ Wrappers ----------------------------------- #

def _conv_vmem_bytes(TH, W, Cin, Cout):
    f32 = 4
    blocks = (TH * W * Cin + 2 * W * Cin          # x tile + two halo rows
              + Cout * TH * W + 2 * Cout)         # y tile + stats accumulators
    weights = 9 * Cin * Cout
    scratch = (TH + 2) * (W + 2) * Cin + TH * W * 9 * Cin
    return (2 * blocks + weights + scratch) * f32  # 2x: double buffering


def _mosaic_params(semantics, est_bytes):
    limit = int(min(100 * 1024 * 1024,
                    max(16 * 1024 * 1024, int(est_bytes * 1.25))))
    return pltpu.CompilerParams(dimension_semantics=semantics,
                                vmem_limit_bytes=limit)


def pick_tile_h(H, W, Cin, Cout, budget_bytes=24 * 1024 * 1024):
    """Largest H-tile (multiple of 8 dividing H) within a v7x-safe VMEM budget."""
    if H % 8 != 0:
        return H                               # fall back to whole-image tiles
    best = 8
    for th in range(8, H + 1, 8):
        if H % th == 0 and _conv_vmem_bytes(th, W, Cin, Cout) <= budget_bytes:
            best = th
    return best


def conv3x3_with_stats(x_nhwc, w2d, TH):
    N, H, W, Cin = x_nhwc.shape
    Cout = w2d.shape[1]
    HT = H // TH

    return pl.pallas_call(
        conv3x3_stats_kernel,
        out_shape=(
            jax.ShapeDtypeStruct((N * HT, Cout, TH * W), jnp.float32),  # y (ch-major)
            jax.ShapeDtypeStruct((N, 1, Cout), jnp.float32),            # per-n sums
            jax.ShapeDtypeStruct((N, 1, Cout), jnp.float32),            # per-n sumsq
        ),
        grid=(N, HT),
        in_specs=[
            pl.BlockSpec((1, TH, W, Cin), lambda n, h: (n, h, 0, 0)),
            pl.BlockSpec((1, 1, W, Cin),
                         lambda n, h: (n, jnp.maximum(h * TH - 1, 0), 0, 0)),
            pl.BlockSpec((1, 1, W, Cin),
                         lambda n, h: (n, jnp.minimum(h * TH + TH, H - 1), 0, 0)),
            pl.BlockSpec((9 * Cin, Cout), lambda n, h: (0, 0)),
        ],
        out_specs=(
            pl.BlockSpec((1, Cout, TH * W), lambda n, h: (n * HT + h, 0, 0)),
            pl.BlockSpec((1, 1, Cout), lambda n, h: (n, 0, 0)),
            pl.BlockSpec((1, 1, Cout), lambda n, h: (n, 0, 0)),
        ),
        scratch_shapes=[
            pltpu.VMEM((TH + 2, W + 2, Cin), jnp.float32),   # padded input tile
            pltpu.VMEM((TH * W, 9 * Cin), jnp.float32),      # im2col patch
        ],
        compiler_params=_mosaic_params(("parallel", "arbitrary"),
                                       _conv_vmem_bytes(TH, W, Cin, Cout)),
    )(x_nhwc, x_nhwc, x_nhwc, w2d)


def bn_relu_to_nchw(y_t, scale, shift, N, H, W, TH):
    Cout = y_t.shape[1]
    HT = H // TH
    est = (2 * (2 * Cout * TH * W) + 2 * Cout) * 4
    return pl.pallas_call(
        bn_relu_nchw_kernel,
        out_shape=jax.ShapeDtypeStruct((N, Cout, H, W), jnp.float32),
        grid=(N, HT),
        in_specs=[
            pl.BlockSpec((1, Cout, TH * W), lambda n, h: (n * HT + h, 0, 0)),
            pl.BlockSpec((Cout, 1), lambda n, h: (0, 0)),
            pl.BlockSpec((Cout, 1), lambda n, h: (0, 0)),
        ],
        out_specs=pl.BlockSpec((1, Cout, TH, W), lambda n, h: (n, 0, h, 0)),
        compiler_params=_mosaic_params(("parallel", "parallel"), est),
    )(y_t, scale, shift)


def con3x3_with_bn_relu(x_nchw, w_oihw, gamma, beta, eps=1e-5, tile_h=None):
    """Forward pass of Con3x3WithBnRelu (BatchNorm2d training mode). NCHW in/out."""
    N, Cin, H, W = x_nchw.shape
    Cout = w_oihw.shape[0]

    # NCHW -> NHWC for the conv kernel; weights -> (9*Cin, Cout), rows (dy, dx, ci).
    x_nhwc = jnp.transpose(x_nchw, (0, 2, 3, 1)).astype(jnp.float32)
    w2d = jnp.transpose(w_oihw, (2, 3, 1, 0)).reshape(9 * Cin, Cout).astype(jnp.float32)

    TH = pick_tile_h(H, W, Cin, Cout) if tile_h is None else tile_h
    assert H % TH == 0 and (TH % 8 == 0 or TH == H), (H, TH)

    y_t, sums, sqs = conv3x3_with_stats(x_nhwc, w2d, TH)

    # BatchNorm (training mode): biased batch variance, as PyTorch uses for
    # the normalization itself.
    count = float(N * H * W)
    mean = jnp.sum(sums[:, 0, :], axis=0) / count
    var = jnp.sum(sqs[:, 0, :], axis=0) / count - mean * mean
    scale = gamma.astype(jnp.float32) / jnp.sqrt(var + eps)
    shift = beta.astype(jnp.float32) - mean * scale

    return bn_relu_to_nchw(y_t, scale[:, None], shift[:, None], N, H, W, TH)


# ------------------------------- Main --------------------------------------- #

if __name__ == "__main__":
    key = jax.random.PRNGKey(0)
    N, Cin, Cout, H, W = 2, 4, 8, 16, 16

    kx, kw = jax.random.split(key)
    x = jax.random.normal(kx, (N, Cin, H, W), dtype=jnp.float32)          # NCHW
    # Conv2d(in_ch, out_ch, 3, padding=1, bias=False) weight: (Cout, Cin, 3, 3)
    w = jax.random.normal(kw, (Cout, Cin, 3, 3), dtype=jnp.float32) * 0.1
    # BatchNorm2d default init: weight (gamma) = 1, bias (beta) = 0.
    gamma = jnp.ones((Cout,), jnp.float32)
    beta = jnp.zeros((Cout,), jnp.float32)

    # Multi-tile path (TH=8 -> 2 H-tiles per image, exercises the halo exchange).
    out = con3x3_with_bn_relu(x, w, gamma, beta, tile_h=8)
    out = jax.block_until_ready(out)
    assert out.shape == (N, Cout, H, W), out.shape

    # Pure-JAX reference.
    eps = 1e-5
    conv_ref = jax.lax.conv_general_dilated(
        x, w, window_strides=(1, 1), padding="SAME",
        dimension_numbers=("NCHW", "OIHW", "NCHW"))
    mean_r = conv_ref.mean(axis=(0, 2, 3), keepdims=True)
    var_r = conv_ref.var(axis=(0, 2, 3), keepdims=True)
    ref = jnp.maximum(
        (conv_ref - mean_r) / jnp.sqrt(var_r + eps)
        * gamma[None, :, None, None] + beta[None, :, None, None], 0.0)

    err = float(jnp.max(jnp.abs(out - ref)))
    assert jnp.allclose(out, ref, atol=1e-4, rtol=1e-4), err

    # Auto tile picker (single-tile path, clamped halos).
    out_auto = jax.block_until_ready(con3x3_with_bn_relu(x, w, gamma, beta))
    err_auto = float(jnp.max(jnp.abs(out_auto - ref)))
    assert jnp.allclose(out_auto, ref, atol=1e-4, rtol=1e-4), err_auto

    print("KERNEL_OK")
</pallas_src>

<mosaic_0001>
module attributes {stable_mosaic.version = 11 : i64} {
  func.func @conv3x3_stats_kernel(%arg0: i32, %arg1: i32, %arg2: memref<1x8x16x4xf32, #tpu.memory_space<vmem>>, %arg3: memref<1x1x16x4xf32, #tpu.memory_space<vmem>>, %arg4: memref<1x1x16x4xf32, #tpu.memory_space<vmem>>, %arg5: memref<36x8xf32, #tpu.memory_space<vmem>>, %arg6: memref<1x8x128xf32, #tpu.memory_space<vmem>>, %arg7: memref<1x1x8xf32, #tpu.memory_space<vmem>>, %arg8: memref<1x1x8xf32, #tpu.memory_space<vmem>>, %arg9: memref<10x18x4xf32, #tpu.memory_space<vmem>>, %arg10: memref<128x36xf32, #tpu.memory_space<vmem>>) attributes {dimension_semantics = [#tpu.dimension_semantics<parallel>, #tpu.dimension_semantics<arbitrary>], iteration_bounds = array<i64: 2, 2>, scalar_prefetch = 0 : i64, scratch_operands = 2 : i64, tpu.core_type = #tpu.core_type<tc>, window_params = [{transform_indices = @transform_0, window_bounds = array<i64: 1, 8, 16, 4>}, {transform_indices = @transform_1, window_bounds = array<i64: 1, 1, 16, 4>}, {transform_indices = @transform_2, window_bounds = array<i64: 1, 1, 16, 4>}, {pipeline_mode = #tpu.pipeline_mode<synchronous>, transform_indices = @transform_3, window_bounds = array<i64: 36, 8>}, {transform_indices = @transform_4, window_bounds = array<i64: 1, 8, 128>}, {transform_indices = @transform_5, window_bounds = array<i64: 1, 1, 8>}, {transform_indices = @transform_6, window_bounds = array<i64: 1, 1, 8>}]} {
    %cst = arith.constant 0.000000e+00 : f32
    %0 = vector.broadcast %cst : f32 to vector<10x18x4xf32>
    %c0 = arith.constant 0 : index
    %c0_0 = arith.constant 0 : index
    %c0_1 = arith.constant 0 : index
    %1 = vector.load %arg9[%c0, %c0_0, %c0_1] : memref<10x18x4xf32, #tpu.memory_space<vmem>>, vector<10x18x4xf32>
    tpu.vector_store %arg9[%c0, %c0_0, %c0_1], %0 {strides = array<i32>} : memref<10x18x4xf32, #tpu.memory_space<vmem>>, vector<10x18x4xf32>,
    %c0_2 = arith.constant 0 : index
    %c0_3 = arith.constant 0 : index
    %c0_4 = arith.constant 0 : index
    %c0_5 = arith.constant 0 : index
    %2 = vector.load %arg2[%c0_2, %c0_3, %c0_4, %c0_5] : memref<1x8x16x4xf32, #tpu.memory_space<vmem>>, vector<1x8x16x4xf32>
    %3 = vector.shape_cast %2 : vector<1x8x16x4xf32> to vector<8x16x4xf32>
    %c1 = arith.constant 1 : index
    %c1_6 = arith.constant 1 : index
    %c0_7 = arith.constant 0 : index
    %4 = vector.load %arg9[%c1, %c1_6, %c0_7] : memref<10x18x4xf32, #tpu.memory_space<vmem>>, vector<8x16x4xf32>
    tpu.vector_store %arg9[%c1, %c1_6, %c0_7], %3 {strides = array<i32>} : memref<10x18x4xf32, #tpu.memory_space<vmem>>, vector<8x16x4xf32>,
    %c0_i32 = arith.constant 0 : i32
    %5 = arith.cmpi sgt, %arg1, %c0_i32 : i32
    %6 = arith.extui %5 : i1 to i32
    %c0_i32_8 = arith.constant 0 : i32
    %7 = arith.cmpi ne, %6, %c0_i32_8 : i32
    scf.if %7 {
      %c0_70 = arith.constant 0 : index
      %c0_71 = arith.constant 0 : index
      %c0_72 = arith.constant 0 : index
      %c0_73 = arith.constant 0 : index
      %59 = vector.load %arg3[%c0_70, %c0_71, %c0_72, %c0_73] : memref<1x1x16x4xf32, #tpu.memory_space<vmem>>, vector<1x1x16x4xf32>
      %60 = vector.shape_cast %59 : vector<1x1x16x4xf32> to vector<1x16x4xf32>
      %c0_74 = arith.constant 0 : index
      %c1_75 = arith.constant 1 : index
      %c0_76 = arith.constant 0 : index
      %61 = vector.load %arg9[%c0_74, %c1_75, %c0_76] : memref<10x18x4xf32, #tpu.memory_space<vmem>>, vector<1x16x4xf32>
      tpu.vector_store %arg9[%c0_74, %c1_75, %c0_76], %60 {strides = array<i32>} : memref<10x18x4xf32, #tpu.memory_space<vmem>>, vector<1x16x4xf32>,
    } else {
    }
    %c1_i32 = arith.constant 1 : i32
    %8 = arith.cmpi slt, %arg1, %c1_i32 : i32
    %9 = arith.extui %8 : i1 to i32
    %c0_i32_9 = arith.constant 0 : i32
    %10 = arith.cmpi ne, %9, %c0_i32_9 : i32
    scf.if %10 {
      %c0_70 = arith.constant 0 : index
      %c0_71 = arith.constant 0 : index
      %c0_72 = arith.constant 0 : index
      %c0_73 = arith.constant 0 : index
      %59 = vector.load %arg4[%c0_70, %c0_71, %c0_72, %c0_73] : memref<1x1x16x4xf32, #tpu.memory_space<vmem>>, vector<1x1x16x4xf32>
      %60 = vector.shape_cast %59 : vector<1x1x16x4xf32> to vector<1x16x4xf32>
      %c9 = arith.constant 9 : index
      %c1_74 = arith.constant 1 : index
      %c0_75 = arith.constant 0 : index
      %61 = vector.load %arg9[%c9, %c1_74, %c0_75] : memref<10x18x4xf32, #tpu.memory_space<vmem>>, vector<1x16x4xf32>
      tpu.vector_store %arg9[%c9, %c1_74, %c0_75], %60 {strides = array<i32>} : memref<10x18x4xf32, #tpu.memory_space<vmem>>, vector<1x16x4xf32>,
    } else {
    }
    %c0_10 = arith.constant 0 : index
    %c0_11 = arith.constant 0 : index
    %c0_12 = arith.constant 0 : index
    %11 = vector.load %arg9[%c0_10, %c0_11, %c0_12] : memref<10x18x4xf32, #tpu.memory_space<vmem>>, vector<8x16x4xf32>
    %12 = vector.shape_cast %11 : vector<8x16x4xf32> to vector<128x4xf32>
    %c0_13 = arith.constant 0 : index
    %c0_14 = arith.constant 0 : index
    %13 = vector.load %arg10[%c0_13, %c0_14] : memref<128x36xf32, #tpu.memory_space<vmem>>, vector<128x4xf32>
    tpu.vector_store %arg10[%c0_13, %c0_14], %12 {strides = array<i32>} : memref<128x36xf32, #tpu.memory_space<vmem>>, vector<128x4xf32>,
    %c0_15 = arith.constant 0 : index
    %c1_16 = arith.constant 1 : index
    %c0_17 = arith.constant 0 : index
    %14 = vector.load %arg9[%c0_15, %c1_16, %c0_17] : memref<10x18x4xf32, #tpu.memory_space<vmem>>, vector<8x16x4xf32>
    %15 = vector.shape_cast %14 : vector<8x16x4xf32> to vector<128x4xf32>
    %c0_18 = arith.constant 0 : index
    %c4 = arith.constant 4 : index
    %16 = vector.load %arg10[%c0_18, %c4] : memref<128x36xf32, #tpu.memory_space<vmem>>, vector<128x4xf32>
    tpu.vector_store %arg10[%c0_18, %c4], %15 {strides = array<i32>} : memref<128x36xf32, #tpu.memory_space<vmem>>, vector<128x4xf32>,
    %c0_19 = arith.constant 0 : index
    %c2 = arith.constant 2 : index
    %c0_20 = arith.constant 0 : index
    %17 = vector.load %arg9[%c0_19, %c2, %c0_20] : memref<10x18x4xf32, #tpu.memory_space<vmem>>, vector<8x16x4xf32>
    %18 = vector.shape_cast %17 : vector<8x16x4xf32> to vector<128x4xf32>
    %c0_21 = arith.constant 0 : index
    %c8 = arith.constant 8 : index
    %19 = vector.load %arg10[%c0_21, %c8] : memref<128x36xf32, #tpu.memory_space<vmem>>, vector<128x4xf32>
    tpu.vector_store %arg10[%c0_21, %c8], %18 {strides = array<i32>} : memref<128x36xf32, #tpu.memory_space<vmem>>, vector<128x4xf32>,
    %c1_22 = arith.constant 1 : index
    %c0_23 = arith.constant 0 : index
    %c0_24 = arith.constant 0 : index
    %20 = vector.load %arg9[%c1_22, %c0_23, %c0_24] : memref<10x18x4xf32, #tpu.memory_space<vmem>>, vector<8x16x4xf32>
    %21 = vector.shape_cast %20 : vector<8x16x4xf32> to vector<128x4xf32>
    %c0_25 = arith.constant 0 : index
    %c12 = arith.constant 12 : index
    %22 = vector.load %arg10[%c0_25, %c12] : memref<128x36xf32, #tpu.memory_space<vmem>>, vector<128x4xf32>
    tpu.vector_store %arg10[%c0_25, %c12], %21 {strides = array<i32>} : memref<128x36xf32, #tpu.memory_space<vmem>>, vector<128x4xf32>,
    %c1_26 = arith.constant 1 : index
    %c1_27 = arith.constant 1 : index
    %c0_28 = arith.constant 0 : index
    %23 = vector.load %arg9[%c1_26, %c1_27, %c0_28] : memref<10x18x4xf32, #tpu.memory_space<vmem>>, vector<8x16x4xf32>
    %24 = vector.shape_cast %23 : vector<8x16x4xf32> to vector<128x4xf32>
    %c0_29 = arith.constant 0 : index
    %c16 = arith.constant 16 : index
    %25 = vector.load %arg10[%c0_29, %c16] : memref<128x36xf32, #tpu.memory_space<vmem>>, vector<128x4xf32>
    tpu.vector_store %arg10[%c0_29, %c16], %24 {strides = array<i32>} : memref<128x36xf32, #tpu.memory_space<vmem>>, vector<128x4xf32>,
    %c1_30 = arith.constant 1 : index
    %c2_31 = arith.constant 2 : index
    %c0_32 = arith.constant 0 : index
    %26 = vector.load %arg9[%c1_30, %c2_31, %c0_32] : memref<10x18x4xf32, #tpu.memory_space<vmem>>, vector<8x16x4xf32>
    %27 = vector.shape_cast %26 : vector<8x16x4xf32> to vector<128x4xf32>
    %c0_33 = arith.constant 0 : index
    %c20 = arith.constant 20 : index
    %28 = vector.load %arg10[%c0_33, %c20] : memref<128x36xf32, #tpu.memory_space<vmem>>, vector<128x4xf32>
    tpu.vector_store %arg10[%c0_33, %c20], %27 {strides = array<i32>} : memref<128x36xf32, #tpu.memory_space<vmem>>, vector<128x4xf32>,
    %c2_34 = arith.constant 2 : index
    %c0_35 = arith.constant 0 : index
    %c0_36 = arith.constant 0 : index
    %29 = vector.load %arg9[%c2_34, %c0_35, %c0_36] : memref<10x18x4xf32, #tpu.memory_space<vmem>>, vector<8x16x4xf32>
    %30 = vector.shape_cast %29 : vector<8x16x4xf32> to vector<128x4xf32>
    %c0_37 = arith.constant 0 : index
    %c24 = arith.constant 24 : index
    %31 = vector.load %arg10[%c0_37, %c24] : memref<128x36xf32, #tpu.memory_space<vmem>>, vector<128x4xf32>
    tpu.vector_store %arg10[%c0_37, %c24], %30 {strides = array<i32>} : memref<128x36xf32, #tpu.memory_space<vmem>>, vector<128x4xf32>,
    %c2_38 = arith.constant 2 : index
    %c1_39 = arith.constant 1 : index
    %c0_40 = arith.constant 0 : index
    %32 = vector.load %arg9[%c2_38, %c1_39, %c0_40] : memref<10x18x4xf32, #tpu.memory_space<vmem>>, vector<8x16x4xf32>
    %33 = vector.shape_cast %32 : vector<8x16x4xf32> to vector<128x4xf32>
    %c0_41 = arith.constant 0 : index
    %c28 = arith.constant 28 : index
    %34 = vector.load %arg10[%c0_41, %c28] : memref<128x36xf32, #tpu.memory_space<vmem>>, vector<128x4xf32>
    tpu.vector_store %arg10[%c0_41, %c28], %33 {strides = array<i32>} : memref<128x36xf32, #tpu.memory_space<vmem>>, vector<128x4xf32>,
    %c2_42 = arith.constant 2 : index
    %c2_43 = arith.constant 2 : index
    %c0_44 = arith.constant 0 : index
    %35 = vector.load %arg9[%c2_42, %c2_43, %c0_44] : memref<10x18x4xf32, #tpu.memory_space<vmem>>, vector<8x16x4xf32>
    %36 = vector.shape_cast %35 : vector<8x16x4xf32> to vector<128x4xf32>
    %c0_45 = arith.constant 0 : index
    %c32 = arith.constant 32 : index
    %37 = vector.load %arg10[%c0_45, %c32] : memref<128x36xf32, #tpu.memory_space<vmem>>, vector<128x4xf32>
    tpu.vector_store %arg10[%c0_45, %c32], %36 {strides = array<i32>} : memref<128x36xf32, #tpu.memory_space<vmem>>, vector<128x4xf32>,
    %c0_46 = arith.constant 0 : index
    %c0_47 = arith.constant 0 : index
    %38 = vector.load %arg10[%c0_46, %c0_47] : memref<128x36xf32, #tpu.memory_space<vmem>>, vector<128x36xf32>
    %c0_48 = arith.constant 0 : index
    %c0_49 = arith.constant 0 : index
    %39 = vector.load %arg5[%c0_48, %c0_49] : memref<36x8xf32, #tpu.memory_space<vmem>>, vector<36x8xf32>
    %cst_50 = arith.constant dense<0.000000e+00> : vector<128x8xf32>
    %40 = tpu.matmul %38, %39, %cst_50 {dimension_numbers = #tpu.dot_dimension_numbers<[1], [0], [0], [1], [0, 0, 1, 1], [], []>} : vector<128x36xf32>, vector<36x8xf32>, vector<128x8xf32> -> vector<128x8xf32>
    %c0_i32_51 = arith.constant 0 : i32
    %41 = arith.cmpi eq, %arg1, %c0_i32_51 : i32
    %42 = arith.extui %41 : i1 to i32
    %c0_i32_52 = arith.constant 0 : i32
    %43 = arith.cmpi ne, %42, %c0_i32_52 : i32
    scf.if %43 {
      %cst_70 = arith.constant 0.000000e+00 : f32
      %59 = vector.broadcast %cst_70 : f32 to vector<1x1x8xf32>
      %c0_71 = arith.constant 0 : index
      %c0_72 = arith.constant 0 : index
      %c0_73 = arith.constant 0 : index
      %60 = vector.load %arg7[%c0_71, %c0_72, %c0_73] : memref<1x1x8xf32, #tpu.memory_space<vmem>>, vector<1x1x8xf32>
      tpu.vector_store %arg7[%c0_71, %c0_72, %c0_73], %59 {strides = array<i32>} : memref<1x1x8xf32, #tpu.memory_space<vmem>>, vector<1x1x8xf32>,
      %cst_74 = arith.constant 0.000000e+00 : f32
      %61 = vector.broadcast %cst_74 : f32 to vector<1x1x8xf32>
      %c0_75 = arith.constant 0 : index
      %c0_76 = arith.constant 0 : index
      %c0_77 = arith.constant 0 : index
      %62 = vector.load %arg8[%c0_75, %c0_76, %c0_77] : memref<1x1x8xf32, #tpu.memory_space<vmem>>, vector<1x1x8xf32>
      tpu.vector_store %arg8[%c0_75, %c0_76, %c0_77], %61 {strides = array<i32>} : memref<1x1x8xf32, #tpu.memory_space<vmem>>, vector<1x1x8xf32>,
    } else {
    }
    %c0_53 = arith.constant 0 : index
    %c0_54 = arith.constant 0 : index
    %c0_55 = arith.constant 0 : index
    %44 = vector.load %arg7[%c0_53, %c0_54, %c0_55] : memref<1x1x8xf32, #tpu.memory_space<vmem>>, vector<1x1x8xf32>
    %cst_56 = arith.constant dense<0.000000e+00> : vector<8xf32>
    %45 = vector.multi_reduction <add>, %40, %cst_56 [0] : vector<128x8xf32> to vector<8xf32>
    %46 = vector.shape_cast %45 : vector<8xf32> to vector<1x1x8xf32>
    %47 = arith.addf %44, %46 : vector<1x1x8xf32>
    %c0_57 = arith.constant 0 : index
    %c0_58 = arith.constant 0 : index
    %c0_59 = arith.constant 0 : index
    %48 = vector.load %arg7[%c0_57, %c0_58, %c0_59] : memref<1x1x8xf32, #tpu.memory_space<vmem>>, vector<1x1x8xf32>
    tpu.vector_store %arg7[%c0_57, %c0_58, %c0_59], %47 {strides = array<i32>} : memref<1x1x8xf32, #tpu.memory_space<vmem>>, vector<1x1x8xf32>,
    %c0_60 = arith.constant 0 : index
    %c0_61 = arith.constant 0 : index
    %c0_62 = arith.constant 0 : index
    %49 = vector.load %arg8[%c0_60, %c0_61, %c0_62] : memref<1x1x8xf32, #tpu.memory_space<vmem>>, vector<1x1x8xf32>
    %50 = arith.mulf %40, %40 : vector<128x8xf32>
    %cst_63 = arith.constant dense<0.000000e+00> : vector<8xf32>
    %51 = vector.multi_reduction <add>, %50, %cst_63 [0] : vector<128x8xf32> to vector<8xf32>
    %52 = vector.shape_cast %51 : vector<8xf32> to vector<1x1x8xf32>
    %53 = arith.addf %49, %52 : vector<1x1x8xf32>
    %c0_64 = arith.constant 0 : index
    %c0_65 = arith.constant 0 : index
    %c0_66 = arith.constant 0 : index
    %54 = vector.load %arg8[%c0_64, %c0_65, %c0_66] : memref<1x1x8xf32, #tpu.memory_space<vmem>>, vector<1x1x8xf32>
    tpu.vector_store %arg8[%c0_64, %c0_65, %c0_66], %53 {strides = array<i32>} : memref<1x1x8xf32, #tpu.memory_space<vmem>>, vector<1x1x8xf32>,
    %55 = tpu.transpose %40, [1, 0] : vector<128x8xf32> -> vector<8x128xf32>
    %c0_67 = arith.constant 0 : index
    %c0_68 = arith.constant 0 : index
    %c0_69 = arith.constant 0 : index
    %56 = vector.load %arg6[%c0_67, %c0_68, %c0_69] : memref<1x8x128xf32, #tpu.memory_space<vmem>>, vector<1x8x128xf32>
    %57 = vector.shape_cast %56 : vector<1x8x128xf32> to vector<8x128xf32>
    %58 = vector.shape_cast %55 : vector<8x128xf32> to vector<1x8x128xf32>
    tpu.vector_store %arg6[%c0_67, %c0_68, %c0_69], %58 {strides = array<i32>} : memref<1x8x128xf32, #tpu.memory_space<vmem>>, vector<1x8x128xf32>,
    return
  }
  func.func @transform_0(%arg0: i32, %arg1: i32) -> (i32, i32, i32, i32) {
    %c0_i32 = arith.constant 0 : i32
    %c0_i32_0 = arith.constant 0 : i32
    %c0_i32_1 = arith.constant 0 : i32
    return %arg0, %arg1, %c0_i32, %c0_i32_0 : i32, i32, i32, i32
  }
  func.func @transform_1(%arg0: i32, %arg1: i32) -> (i32, i32, i32, i32) {
    %c8_i32 = arith.constant 8 : i32
    %0 = arith.muli %arg1, %c8_i32 : i32
    %c1_i32 = arith.constant 1 : i32
    %1 = arith.subi %0, %c1_i32 : i32
    %c0_i32 = arith.constant 0 : i32
    %2 = arith.maxsi %1, %c0_i32 : i32
    %c0_i32_0 = arith.constant 0 : i32
    %c0_i32_1 = arith.constant 0 : i32
    %c0_i32_2 = arith.constant 0 : i32
    return %arg0, %2, %c0_i32_0, %c0_i32_1 : i32, i32, i32, i32
  }
  func.func @transform_2(%arg0: i32, %arg1: i32) -> (i32, i32, i32, i32) {
    %c8_i32 = arith.constant 8 : i32
    %0 = arith.muli %arg1, %c8_i32 : i32
    %c8_i32_0 = arith.constant 8 : i32
    %1 = arith.addi %0, %c8_i32_0 : i32
    %c15_i32 = arith.constant 15 : i32
    %2 = arith.minsi %1, %c15_i32 : i32
    %c0_i32 = arith.constant 0 : i32
    %c0_i32_1 = arith.constant 0 : i32
    %c0_i32_2 = arith.constant 0 : i32
    return %arg0, %2, %c0_i32, %c0_i32_1 : i32, i32, i32, i32
  }
  func.func @transform_3(%arg0: i32, %arg1: i32) -> (i32, i32) {
    %c0_i32 = arith.constant 0 : i32
    %c0_i32_0 = arith.constant 0 : i32
    %c0_i32_1 = arith.constant 0 : i32
    return %c0_i32, %c0_i32_0 : i32, i32
  }
  func.func @transform_4(%arg0: i32, %arg1: i32) -> (i32, i32, i32) {
    %c2_i32 = arith.constant 2 : i32
    %0 = arith.muli %arg0, %c2_i32 : i32
    %1 = arith.addi %0, %arg1 : i32
    %c0_i32 = arith.constant 0 : i32
    %c0_i32_0 = arith.constant 0 : i32
    %c0_i32_1 = arith.constant 0 : i32
    return %1, %c0_i32, %c0_i32_0 : i32, i32, i32
  }
  func.func @transform_5(%arg0: i32, %arg1: i32) -> (i32, i32, i32) {
    %c0_i32 = arith.constant 0 : i32
    %c0_i32_0 = arith.constant 0 : i32
    %c0_i32_1 = arith.constant 0 : i32
    return %arg0, %c0_i32, %c0_i32_0 : i32, i32, i32
  }
  func.func @transform_6(%arg0: i32, %arg1: i32) -> (i32, i32, i32) {
    %c0_i32 = arith.constant 0 : i32
    %c0_i32_0 = arith.constant 0 : i32
    %c0_i32_1 = arith.constant 0 : i32
    return %arg0, %c0_i32, %c0_i32_0 : i32, i32, i32
  }
}

</mosaic_0001>

<bundles_post_ra>
// kernel: tpu_custom_call.1
= control target key start
LH: loop header
LB: loop body
LE: loop exit
PB: predicated region body
PF: predicated region fallthrough
CT: control target
= control target key end

     0   :  { %s3268_s0 = inlined_call_operand.vmem [shape: f32[2,16,16,4], index: 0, kind: input, shape index: {}]   ;;  %s3269_s1 = inlined_call_operand.vmem [shape: f32[2,16,16,4], index: 1, kind: input, shape index: {}]   ;;  %s3270_s2 = inlined_call_operand.vmem [shape: f32[2,16,16,4], index: 2, kind: input, shape index: {}]   ;;  %s3271_s3 = inlined_call_operand.vmem [shape: f32[36,8], index: 3, kind: input, shape index: {}]   ;;  %s3272_s4 = inlined_call_operand.hbm [shape: f32[4,8,128], index: 4, kind: output, shape index: {0}]   ;;  %s3273_s5 = inlined_call_operand.hbm [shape: f32[2,1,8], index: 5, kind: output, shape index: {1}]   ;;  %s3274_s6 = inlined_call_operand.hbm [shape: f32[2,1,8], index: 6, kind: output, shape index: {2}]  }
   0x1   :  { %3288 = sst [smem:[#allocation22_spill]] %s3268_s0 }
   0x2   :  { %3289 = sst [smem:[#allocation23_spill]] %s3272_s4 }
   0x3   :  { %12 = vsyncpa [#allocation5], 0 }
   0x4   :  { %14 = vsyncpa [#allocation5 + $0x1], 0 }
   0x5   :  { %15 = vsyncpa [#allocation7], 0 }
   0x6   :  { %17 = vsyncpa [#allocation7 + $0x1], 0  ;;  %s2377_s21 = smov 0   ;;  %s2379_s22 = smov 0  }
   0x7   :  { %s2381_s23 = smov 0   ;;  %s2383_s24 = smov 0  }
   0x8   :  { %s2385_s25 = smov 0   ;;  %s2387_s26 = smov 0  }
   0x9   :  { %s2389_s27 = smov 0   ;;  %s2391_s28 = smov 0  }
   0xa   :  { %s2393_s29 = smov 0   ;;  %s2395_s30 = smov 0  }
   0xb   :  { %s2397_s7 = smov 0  }
   0xc LB: > { %3290 = sst [smem:[#allocation11_spill]] %s2295_s23  ;;  %s3276_s8 = sadd.s32 4294967295, %s2327_s7   ;;  %s2327_s7 = sphi %s2397_s7, %s23_s7   ;;  %s2323_s30 = sphi %s2395_s30, %s3326_s30   ;;  %s2319_s29 = sphi %s2393_s29, %s3331_s29   ;;  %s2315_s28 = sphi %s2391_s28, %s3324_s28   ;;  %s2311_s27 = sphi %s2389_s27, %s3323_s27   ;;  %s2307_s26 = sphi %s2387_s26, %s3322_s26   ;;  %s2303_s25 = sphi %s2385_s25, %s3330_s25   ;;  %s2299_s24 = sphi %s2383_s24, %s3329_s24   ;;  %s2295_s23 = sphi %s2381_s23, %s3320_s23   ;;  %s2291_s22 = sphi %s2379_s22, %s3328_s22   ;;  %s2287_s21 = sphi %s2377_s21, %s3327_s21  }
   0xd   : > { %3291 = sst [smem:[#allocation12_spill]] %s2299_s24  ;;  %s3275_s9 = sadd.s32 4294967294, %s2327_s7  }
   0xe   : > { %3292 = sst [smem:[#allocation13_spill]] %s2307_s26  ;;  %s32_s10 = sadd.s32 1, %s2319_s29 }
   0xf   : > { %3293 = sst [smem:[#allocation14_spill]] %s2319_s29  ;;  %s35_s11 = sadd.s32 1, %s2323_s30 }
  0x10   : > { %3294 = sst [smem:[#allocation15_spill]] %s2323_s30  ;;  %p33_p0 = scmp.ge.s32.totalorder %s32_s10, 2 }
  0x11   : > { %s1909_s12 = sshll.u32 %s2323_s30, 1  ;;  %s167_s14 = sadd.s32 1, %s2307_s26 }
  0x12   : > { %s161_s13 = sadd.s32 %s2319_s29, %s1909_s12  ;;  %s3333_s10 = smov (%p33_p0, %s32_s10), 0 }
  0x13   : > { %3295 = sst [smem:[#allocation16_spill]] %s3333_s10  ;;  %s3335_s11 = smov (!%p33_p0, %s35_s11), %s2323_s30 }
  0x14   : > { %p177_p1 = scmp.ne.s32.totalorder %s2307_s26, %s2303_s25  ;;  %p2446_p2 = scmp.eq.s32.totalorder %s3276_s8, 3 }
  0x15   : > { %p37_p3 = scmp.ge.s32.totalorder %s3335_s11, 2  ;;  %p183_p4 = scmp.ne.s32.totalorder %s2303_s25, %s2299_s24 }
  0x16   : > { %p2454_p5 = por %p2446_p2, %p177_p1  ;;  %p2460_p6 = scmp.eq.s32.totalorder %s3275_s9, 3 }
  0x17   : > { %s3337_s11 = smov (%p37_p3, %s3335_s11), 0  ;;  %s193_s19 = sadd.s32 1, %s2295_s23 }
  0x18   : > { %3299 = sst [smem:[#allocation17_spill]] %s3337_s11  ;;  %p2468_p7 = por %p2460_p6, %p183_p4 }
  0x19   : > { %s1910_s20 = sshll.u32 %s3337_s11, 1  ;;  %s190_s12 = ssub.s32 %s2323_s30, %s3337_s11 }
  0x1a   : > { %s3300_s18 = scalar_select %p2468_p7, 1, 0 }
  0x1b   : > { %s163_s9 = sadd.s32 %s1910_s20, %s3333_s10  ;;  %p191_p8 = scmp.eq.s32.totalorder %s190_s12, 0 }
  0x1c   : > { %3301 = sst [smem:[#allocation18_spill]] %s3300_s18  ;;  %s164_s8 = ssub.s32 %s161_s13, %s163_s9 }
  0x1d   : > { %p203_p9 = scmp.ne.s32.totalorder %s2295_s23, %s2291_s22  ;;  %p165_p10 = scmp.eq.s32.totalorder %s164_s8, 0 }
  0x1e   : > { %p209_p11 = scmp.ne.s32.totalorder %s2291_s22, %s2287_s21  ;;  %p1913_p0 = scmp.ge.s32.totalorder %s2327_s7, 1 }
  0x1f   : > { %s2482_s29 = scalar_select %p191_p8, %s2295_s23, %s193_s19  }
  0x20   : > { %s2485_s24 = scalar_select %p165_p10, %s2307_s26, %s167_s14  }
  0x21   : > { %3302 = sst [smem:[#allocation19_spill]] %s2482_s29  ;;  %p2489_p12 = por %p203_p9, %p2446_p2 }
  0x22   : > { %3303 = sst [smem:[#allocation20_spill]] %s2485_s24  ;;  %p2495_p13 = por %p209_p11, %p2460_p6 }
  0x23   : > { %p311_p1 = scmp.lt.s32.totalorder %s2327_s7, 5 }
  0x24   : > { %s3305_s18 = scalar_select %p2495_p13, 1, 0 }
  0x25   : > { %p312_p3 = pnand %p1913_p0, %p311_p1 }
  0x26   : > { %3306 = sst [smem:[#allocation21_spill]] %s3305_s18  ;;  %vm427_vm0 = vcmask (!%p312_p3), 31744   ;;  %vm430_vm1 = vcmask (!%p312_p3), 25600   ;;  %s3283_s21 = sand.u32 (!%p312_p3), 1, %s2303_s25   ;;  %v2329_v0 = vmov (!%p312_p3), 0.0  }
  0x27   : > { %315 = sbr.rel (%p312_p3) target bundleno = 833 (0x341), region = 36  ;;  %432 = vst.msk [vmem:[#allocation2 + $0x18] sm:$0xff] (!%p312_p3), %vm427_vm0, %v2329_v0  ;;  %428 = vst.msk [vmem:[#allocation2] sm:$0xff] (!%p312_p3), %vm427_vm0, %v2329_v0  ;;  %s2535_s9 = sshll.u32 (!%p312_p3), %s3283_s21, 3 }
  0x28   : > { %429 = vst.msk [vmem:[#allocation2 + $0x8] sm:$0xff] (!%p312_p3), %vm427_vm0, %v2329_v0  ;;  %433 = vst.msk [vmem:[#allocation2 + $0x20] sm:$0xff] (!%p312_p3), %vm427_vm0, %v2329_v0  ;;  %s1915_s13 = sshll.u32 (!%p312_p3), %s2311_s27, 3  ;;  %p381_p2 = scmp.lt.s32.totalorder (!%p312_p3), %s2315_s28, 1 }
  0x29   : > { %435 = vst.msk [vmem:[#allocation2 + $0x30] sm:$0xff] (!%p312_p3), %vm427_vm0, %v2329_v0  ;;  %436 = vst.msk [vmem:[#allocation2 + $0x38] sm:$0xff] (!%p312_p3), %vm427_vm0, %v2329_v0  ;;  %p383_p4 = scmp.lt.s32.totalorder (!%p312_p3), %s1915_s13, 15  ;;  %s1920_s14 = sadd.s32 (!%p312_p3), 4294967295, %s1915_s13 }
  0x2a   : > { %438 = vst.msk [vmem:[#allocation2 + $0x48] sm:$0xff] (!%p312_p3), %vm427_vm0, %v2329_v0  ;;  %439 = vst.msk [vmem:[#allocation2 + $0x50] sm:$0xff] (!%p312_p3), %vm427_vm0, %v2329_v0  ;;  %p393_p6 = scmp.gt.s32.totalorder (!%p312_p3), %s1920_s14, 0  ;;  %p1921_p8 = scmp.lt.s32.totalorder (!%p312_p3), %s1920_s14, 15 }
  0x2b   : > { %441 = vst.msk [vmem:[#allocation2 + $0x60] sm:$0xff] (!%p312_p3), %vm427_vm0, %v2329_v0  ;;  %442 = vst.msk [vmem:[#allocation2 + $0x68] sm:$0xff] (!%p312_p3), %vm427_vm0, %v2329_v0  ;;  %s409_s8 = sadd.s32 (!%p312_p3), 8, %s1915_s13  ;;  %s3308_s0 = sld [smem:[#allocation22_spill]] (!%p312_p3) }
  0x2c   : > { %444 = vst.msk [vmem:[#allocation2 + $0x78] sm:$0xff] (!%p312_p3), %vm427_vm0, %v2329_v0  ;;  %445 = vst.msk [vmem:[#allocation2 + $0x80] sm:$0xff] (!%p312_p3), %vm427_vm0, %v2329_v0  ;;  %p2543_p9 = scmp.lt.s32.totalorder (!%p312_p3), %s409_s8, 15  ;;  %s3309_s26 = sand.u32 (!%p312_p3), 1, %s2291_s22  }
  0x2d   : > { %447 = vst.msk [vmem:[#allocation2 + $0x90] sm:$0xff] (!%p312_p3), %vm427_vm0, %v2329_v0  ;;  %448 = vst.msk [vmem:[#allocation2 + $0x98] sm:$0xff] (!%p312_p3), %vm427_vm0, %v2329_v0  ;;  %s2603_s29 = scalar_lea.vmem (!%p312_p3), [#allocation6], %s3309_s26  ;;  %s3310_s23 = smov (!%p312_p3), %s3309_s26 }
  0x2e   : > { %450 = vst.msk [vmem:[#allocation2 + $0xa8] sm:$0xff] %vm427_vm0, %v2329_v0  ;;  %451 = vst.msk [vmem:[#allocation2 + $0xb0] sm:$0xff] %vm427_vm0, %v2329_v0  ;;  %s382_s15 = scalar_select %p381_p2, %s2315_s28, 1 }
  0x2f   : > { %453 = vst.msk [vmem:[#allocation2 + $0xc0] sm:$0xff] %vm427_vm0, %v2329_v0  ;;  %454 = vst.msk [vmem:[#allocation2 + $0xc8] sm:$0xff] %vm427_vm0, %v2329_v0  ;;  %s384_s17 = scalar_select %p383_p4, %s1915_s13, 15 }
  0x30   : > { %456 = vst.msk [vmem:[#allocation2 + $0xd8] sm:$0xff] %vm427_vm0, %v2329_v0  ;;  %457 = vst.msk [vmem:[#allocation2 + $0xe0] sm:$0xff] %vm427_vm0, %v2329_v0  ;;  %s2540_s19 = sshll.u32 %s382_s15, 5  ;;  %s3339_s8 = smov (!%p2543_p9, %s409_s8), 15 }
  0x31   : > { %434 = vst.msk [vmem:[#allocation2 + $0x28] sm:$0x3] %vm430_vm1, %v2329_v0  ;;  %431 = vst.msk [vmem:[#allocation2 + $0x10] sm:$0x3] %vm430_vm1, %v2329_v0  ;;  %s1916_s20 = sshll.u32 %s384_s17, 1  ;;  %s3343_s8 = smov (!%p2543_p9, %s3339_s8), 15 }
  0x32   : > { %437 = vst.msk [vmem:[#allocation2 + $0x40] sm:$0x3] %vm430_vm1, %v2329_v0  ;;  %440 = vst.msk [vmem:[#allocation2 + $0x58] sm:$0x3] %vm430_vm1, %v2329_v0  ;;  %s387_s12 = sadd.s32 %s2540_s19, %s1916_s20  ;;  %s2607_s18 = scalar_lea.vmem [#allocation8], %s3310_s23 }
  0x33   : > { %443 = vst.msk [vmem:[#allocation2 + $0x70] sm:$0x3] %vm430_vm1, %v2329_v0  ;;  %446 = vst.msk [vmem:[#allocation2 + $0x88] sm:$0x3] %vm430_vm1, %v2329_v0  ;;  %s1918_s11 = sshll.u32 %s387_s12, 3  ;;  %p1936_p10 = scmp.le.s32.totalorder %s2311_s27, 0 }
  0x34   : > { %449 = vst.msk [vmem:[#allocation2 + $0xa0] sm:$0x3] %vm430_vm1, %v2329_v0  ;;  %452 = vst.msk [vmem:[#allocation2 + $0xb8] sm:$0x3] %vm430_vm1, %v2329_v0  ;;  %s2550_s24 = scalar_lea.vmem %s3308_s0, %s1918_s11  ;;  %s1933_s11 = sshll.u32 %s3343_s8, 1 }
  0x35   : > { %455 = vst.msk [vmem:[#allocation2 + $0xd0] sm:$0x3] %vm430_vm1, %v2329_v0  ;;  %458 = vst.msk [vmem:[#allocation2 + $0xe8] sm:$0x3] %vm430_vm1, %v2329_v0  ;;  %s394_s15 = scalar_select %p393_p6, %s1920_s14, 0  ;;  %v459_v1 = vld [vmem:[%s2550_s24] sm:$0xff] }
  0x36   : > { %v460_v2 = vld [vmem:[%s2550_s24 + $0x8] sm:$0xff]  ;;  %v461_v3 = vld [vmem:[%s2550_s24 + $0x10] sm:$0xff]  ;;  %476 = vst.msk [vmem:[#allocation2 + $0x19] sm:$0xff] %vm427_vm0, %v459_v1  ;;  %v462_v4 = vld [vmem:[%s2550_s24 + $0x18] sm:$0xff]  ;;  %s418_s13 = sadd.s32 %s1933_s11, %s2540_s19 }
  0x37   : > { %477 = vst.msk [vmem:[#allocation2 + $0x21] sm:$0xff] %vm427_vm0, %v460_v2  ;;  %478 = vst.msk [vmem:[#allocation2 + $0x31] sm:$0xff] %vm427_vm0, %v461_v3  ;;  %v463_v5 = vld [vmem:[%s2550_s24 + $0x20] sm:$0xff]  ;;  %v464_v6 = vld [vmem:[%s2550_s24 + $0x28] sm:$0xff]  ;;  %s3341_s15 = smov (!%p1921_p8, %s394_s15), 15  ;;  %s1935_s12 = sshll.u32 %s418_s13, 3 }
  0x38   : > { %479 = vst.msk [vmem:[#allocation2 + $0x39] sm:$0xff] %vm427_vm0, %v462_v4  ;;  %480 = vst.msk [vmem:[#allocation2 + $0x49] sm:$0xff] %vm427_vm0, %v463_v5  ;;  %v465_v7 = vld [vmem:[%s2550_s24 + $0x30] sm:$0xff]  ;;  %v466_v8 = vld [vmem:[%s2550_s24 + $0x38] sm:$0xff]  ;;  %s1926_s30 = sshll.u32 %s3341_s15, 1  ;;  %s420_s8 = scalar_lea.vmem %s3270_s2, %s1935_s12 }
  0x39   : > { %481 = vst.msk [vmem:[#allocation2 + $0x51] sm:$0xff] %vm427_vm0, %v464_v6  ;;  %v467_v9 = vld [vmem:[%s2550_s24 + $0x40] sm:$0xff]  ;;  %482 = vst.msk [vmem:[#allocation2 + $0x61] sm:$0xff] %vm427_vm0, %v465_v7  ;;  %v468_v10 = vld [vmem:[%s2550_s24 + $0x48] sm:$0xff]  ;;  %s401_s10 = sadd.s32 %s1926_s30, %s2540_s19  ;;  %s367_s30 = scalar_lea.vmem [#allocation4], %s2535_s9 }
  0x3a   : > { %483 = vst.msk [vmem:[#allocation2 + $0x69] sm:$0xff] %vm427_vm0, %v466_v8  ;;  %484 = vst.msk [vmem:[#allocation2 + $0x79] sm:$0xff] %vm427_vm0, %v467_v9  ;;  %v469_v11 = vld [vmem:[%s2550_s24 + $0x50] sm:$0xff]  ;;  %v470_v12 = vld [vmem:[%s2550_s24 + $0x58] sm:$0xff]  ;;  %s1928_s21 = sshll.u32 %s401_s10, 3  ;;  %495 = sbr.rel (%p1936_p10) target bundleno = 65 (0x41), region = 40 }
  0x3b   : > { %485 = vst.msk [vmem:[#allocation2 + $0x81] sm:$0xff] %vm427_vm0, %v468_v10  ;;  %486 = vst.msk [vmem:[#allocation2 + $0x91] sm:$0xff] %vm427_vm0, %v469_v11  ;;  %v471_v13 = vld [vmem:[%s2550_s24 + $0x60] sm:$0xff]  ;;  %v472_v14 = vld [vmem:[%s2550_s24 + $0x68] sm:$0xff]  ;;  %s403_s20 = scalar_lea.vmem %s3269_s1, %s1928_s21 }
  0x3c   : > { %487 = vst.msk [vmem:[#allocation2 + $0x99] sm:$0xff] %vm427_vm0, %v470_v12  ;;  %v473_v15 = vld [vmem:[%s2550_s24 + $0x70] sm:$0xff]  ;;  %488 = vst.msk [vmem:[#allocation2 + $0xa9] sm:$0xff] %vm427_vm0, %v471_v13  ;;  %v474_v16 = vld [vmem:[%s2550_s24 + $0x78] sm:$0xff] }
  0x3d   : > { %489 = vst.msk [vmem:[#allocation2 + $0xb1] sm:$0xff] %vm427_vm0, %v472_v14  ;;  %490 = vst.msk [vmem:[#allocation2 + $0xc1] sm:$0xff] %vm427_vm0, %v473_v15  ;;  %v496_v17 = vld [vmem:[%s403_s20] sm:$0xff] (!%p1936_p10)  ;;  %v497_v18 = vld [vmem:[%s403_s20 + $0x8] sm:$0xff] (!%p1936_p10) }
  0x3e   : > { %491 = vst.msk [vmem:[#allocation2 + $0xc9] sm:$0xff] %vm427_vm0, %v474_v16  ;;  %498 = vst.msk [vmem:[#allocation2 + $0x1] sm:$0xff] (!%p1936_p10), %vm427_vm0, %v496_v17 }
  0x3f   : > { %499 = vst.msk [vmem:[#allocation2 + $0x9] sm:$0xff] (!%p1936_p10), %vm427_vm0, %v497_v18 }
  0x41 PF: > { %p1937_p11 = scmp.ge.s32.totalorder %s2311_s27, 1 }
  0x42   : > { %v504_v19 = vld [vmem:[%s420_s8] sm:$0xff] (!%p1937_p11)  ;;  %v505_v20 = vld [vmem:[%s420_s8 + $0x8] sm:$0xff] (!%p1937_p11) }
  0x43   : > { %503 = sbr.rel (%p1937_p11) target bundleno = 74 (0x4a), region = 44  ;;  %507 = vst.msk [vmem:[#allocation2 + $0xd9] sm:$0xff] (!%p1937_p11), %vm427_vm0, %v504_v19  ;;  %508 = vst.msk [vmem:[#allocation2 + $0xe1] sm:$0xff] (!%p1937_p11), %vm427_vm0, %v505_v20 }
  0x4a PF: > { %v542_v21 = vld [vmem:[#allocation2 + $0x9] sm:$0xff]  ;;  %v541_v22 = vld [vmem:[#allocation2 + $0x1] sm:$0xff]  ;;  %s2330_s0 = smov 4   ;;  %v2621_v25 = vld [vmem:[#allocation2 + $0x78] sm:$0xff]  ;;  %s2331_s23 = smov 8   ;;  %vm1388_vm2 = vcmask 1043456  }
  0x4b   : > { %575 = vrot.lane.b32.xlu1 %v542_v21, %s2330_s0  ;;  %573 = vrot.lane.b32.xlu0 %v541_v22, %s2330_s0  ;;  %v2617_v23 = vld [vmem:[#allocation2 + $0x69] sm:$0xff]  ;;  %v2619_v24 = vld [vmem:[#allocation2 + $0x61] sm:$0xff]  ;;  %v735_v26 = vld [vmem:[#allocation2 + $0x18] sm:$0xff]  ;;  %535 = vst.msk [vmem:[#allocation3 + $0x50] sm:$0xff] %vm427_vm0, %v2621_v25  ;;  %s2332_s24 = smov 12   ;;  %s2333_s26 = smov 16  }
  0x4c   : > { %v2623_v27 = vld [vmem:[#allocation2 + $0x80] sm:$0xff]  ;;  %527 = vst.msk [vmem:[#allocation3 + $0x10] sm:$0xff] %vm427_vm0, %v735_v26  ;;  %v2637_v31 = vld [vmem:[#allocation2 + $0x90] sm:$0xff]  ;;  %v2641_v33 = vld [vmem:[#allocation2 + $0x98] sm:$0xff]  ;;  %s2334_s19 = smov 20   ;;  %s2335_s10 = smov 24  }
  0x4d   : > { %v736_v28 = vld [vmem:[#allocation2 + $0x20] sm:$0xff]  ;;  %536 = vst.msk [vmem:[#allocation3 + $0x58] sm:$0xff] %vm427_vm0, %v2623_v27  ;;  %v2639_v32 = vld [vmem:[#allocation2 + $0x30] sm:$0xff]  ;;  %v2643_v34 = vld [vmem:[#allocation2 + $0x38] sm:$0xff]  ;;  %s2336_s11 = smov 28   ;;  %s2337_s20 = smov 32  }
  0x4e   : > { %528 = vst.msk [vmem:[#allocation3 + $0x18] sm:$0xff] %vm427_vm0, %v736_v28  ;;  %v2635_v29 = vld [vmem:[#allocation2 + $0x62] sm:$0xff]  ;;  %537 = vst.msk [vmem:[#allocation3 + $0x60] sm:$0xff] %vm427_vm0, %v2637_v31  ;;  %v2656_v35 = vld [vmem:[#allocation2 + $0x6a] sm:$0xff]  ;;  %vm621_vm3 = vcmask 64544   ;;  %vm718_vm4 = vcmask 97344  }
  0x4f   : > { %591 = vrot.lane.b32.xlu1 %v2617_v23, %s2330_s0  ;;  %589 = vrot.lane.b32.xlu0 %v2619_v24, %s2330_s0  ;;  %v638_v30 = vld [vmem:[#allocation2 + $0x2] sm:$0xff]  ;;  %529 = vst.msk [vmem:[#allocation3 + $0x20] sm:$0xff] %vm427_vm0, %v2639_v32  ;;  %538 = vst.msk [vmem:[#allocation3 + $0x68] sm:$0xff] %vm427_vm0, %v2641_v33  ;;  %v639_v36 = vld [vmem:[#allocation2 + $0xa] sm:$0xff]  ;;  %vm815_vm5 = vcmask 130144   ;;  %vm912_vm6 = vcmask 162944  }
  0x50   : > { %530 = vst.msk [vmem:[#allocation3 + $0x28] sm:$0xff] %vm427_vm0, %v2643_v34  ;;  %v510_v37 = vld [vmem:[#allocation2 + $0x8] sm:$0xff]  ;;  %v509_v38 = vld [vmem:[#allocation2] sm:$0xff]  ;;  %v2668_v43 = vld [vmem:[#allocation2 + $0xb0] sm:$0xff]  ;;  %vm1009_vm7 = vcmask 195744   ;;  %vm1107_vm8 = vcmask 228544  }
  0x51   : > { %526 = vst.msk [vmem:[#allocation3 + $0x8] sm:$0xff] %vm427_vm0, %v510_v37  ;;  %v2659_v39 = vld [vmem:[#allocation2 + $0xa8] sm:$0xff]  ;;  %525 = vst.msk [vmem:[#allocation3] sm:$0xff] %vm427_vm0, %v509_v38  ;;  %v2666_v42 = vld [vmem:[#allocation2 + $0x60] sm:$0xff]  ;;  %vm1204_vm9 = vcmask 261344   ;;  %vm1301_vm10 = vcmask 294144  }
  0x52   : > { %v2661_v40 = vld [vmem:[#allocation2 + $0x48] sm:$0xff]  ;;  %539 = vst.msk [vmem:[#allocation3 + $0x70] sm:$0xff] %vm427_vm0, %v2659_v39  ;;  %533 = vst.msk [vmem:[#allocation3 + $0x40] sm:$0xff] %vm427_vm0, %v2666_v42  ;;  %v2681_v44 = vld [vmem:[#allocation2 + $0x50] sm:$0xff]  ;;  %vm1339_vm11 = vcmask 293888   ;;  %p1955_p0 = scmp.ne.s32.totalorder %s2311_s27, 0 }
  0x53   : > { %686 = vrot.lane.b32.xlu1 %v2635_v29, %s2331_s23  ;;  %670 = vrot.lane.b32.xlu0 %v638_v30, %s2331_s23  ;;  %v2664_v41 = vld [vmem:[#allocation2 + $0x68] sm:$0xff]  ;;  %531 = vst.msk [vmem:[#allocation3 + $0x30] sm:$0xff] %vm427_vm0, %v2661_v40  ;;  %540 = vst.msk [vmem:[#allocation3 + $0x78] sm:$0xff] %vm427_vm0, %v2668_v43  ;;  %v2693_v45 = vld [vmem:[#allocation2 + $0x79] sm:$0xff]  ;;  %vm1541_vm12 = vcmask (!%p1955_p0), 57344  }
  0x54   : > { %534 = vst.msk [vmem:[#allocation3 + $0x48] sm:$0xff] %vm427_vm0, %v2664_v41  ;;  %532 = vst.msk [vmem:[#allocation3 + $0x38] sm:$0xff] %vm427_vm0, %v2681_v44  ;;  %v832_v46 = vld [vmem:[#allocation2 + $0x19] sm:$0xff]  ;;  %v2701_v47 = vld [vmem:[#allocation2 + $0x81] sm:$0xff] }
  0x55   : > { %v833_v48 = vld [vmem:[#allocation2 + $0x21] sm:$0xff]  ;;  %v1132_v53 = vld [vmem:[#allocation2 + $0x91] sm:$0xff]  ;;  %v1133_v55 = vld [vmem:[#allocation2 + $0x99] sm:$0xff] }
  0x56   : > { %v2706_v49 = vld [vmem:[#allocation2 + $0x7a] sm:$0xff]  ;;  %v2717_v51 = vld [vmem:[#allocation2 + $0x82] sm:$0xff]  ;;  %v1124_v54 = vld [vmem:[#allocation2 + $0x31] sm:$0xff] }
  0x57   : > { %688 = vrot.lane.b32.xlu1 %v2656_v35, %s2331_s23  ;;  %672 = vrot.lane.b32.xlu0 %v639_v36, %s2331_s23  ;;  %v929_v50 = vld [vmem:[#allocation2 + $0x1a] sm:$0xff]  ;;  %v930_v52 = vld [vmem:[#allocation2 + $0x22] sm:$0xff]  ;;  %v1229_v57 = vld [vmem:[#allocation2 + $0x92] sm:$0xff] }
  0x58   : > { %v1125_v56 = vld [vmem:[#allocation2 + $0x39] sm:$0xff]  ;;  %v1335_v60 = vld [vmem:[%s3271_s3 + $0x8] sm:$0xff]  ;;  %v1336_v62 = vld [vmem:[%s3271_s3 + $0x10] sm:$0xff] }
  0x59   : > { %v1221_v58 = vld [vmem:[#allocation2 + $0x32] sm:$0xff]  ;;  %v1334_v59 = vld [vmem:[%s3271_s3] sm:$0xff]  ;;  %v1134_v12 = vld [vmem:[#allocation2 + $0xa9] sm:$0xff] }
  0x5a   : > { %v2020_v61 = vpack.c.bf16 %v1335_v60, %v1334_v59  ;;  %v1337_v63 = vld [vmem:[%s3271_s3 + $0x18] sm:$0xff]  ;;  %v1338_v1 = vld [vmem:[%s3271_s3 + $0x20] sm:$0xf]  ;;  %v1126_v13 = vld [vmem:[#allocation2 + $0x49] sm:$0xff] }
  0x5b   : > { %783 = vrot.lane.b32.xlu1 %v2621_v25, %s2332_s24  ;;  %767 = vrot.lane.b32.xlu0 %v735_v26, %s2332_s24  ;;  %v2024_v0 = vpack.c.bf16 %v1337_v63, %v1336_v62  ;;  %v1230_v2 = vld [vmem:[#allocation2 + $0x9a] sm:$0xff]  ;;  %v1135_v20 = vld [vmem:[#allocation2 + $0xb1] sm:$0xff]  ;;  %v1040_v63 = vld [vmem:[#allocation2 + $0xc8] sm:$0xff] }
  0x5c   : > { %2021 = vmatprep.subr.bf16.mxu0 %v2020_v61  ;;  %2028 = vmatprep.subr.bf16.mxu1 %v2020_v61  ;;  %v1222_v3 = vld [vmem:[#allocation2 + $0x3a] sm:$0xff]  ;;  %v1127_v21 = vld [vmem:[#allocation2 + $0x51] sm:$0xff] }
  0x5d   : > { %2023 = vmatpush3.bf16.msra.mxu0 %v2020_v61  ;;  %2031 = vmatpush3.bf16.msra.mxu1 %v2020_v61  ;;  %v1223_v30 = vld [vmem:[#allocation2 + $0x4a] sm:$0xff] }
  0x5e   : > { %2025 = vmatprep.subr.bf16.mxu0 %v2024_v0  ;;  %2029 = vmatprep.subr.bf16.mxu1 %v2024_v0 }
  0x5f   : > { %785 = vrot.lane.b32.xlu1 %v2623_v27, %s2332_s24  ;;  %769 = vrot.lane.b32.xlu0 %v736_v28, %s2332_s24  ;;  %v1231_v28 = vld [vmem:[#allocation2 + $0xaa] sm:$0xff] }
  0x61   : > { %2027 = vmatpush3.bf16.msra.mxu0 %v2024_v0  ;;  %2032 = vmatpush3.bf16.msra.mxu1 %v2024_v0 }
  0x62   : > { %1994 = vmatprep.subr.msk.mxu0 %vm1388_vm2, %v1338_v1  ;;  %2030 = vmatprep.subr.msk.mxu1 %vm1388_vm2, %v1338_v1 }
  0x63   : > { %880 = vrot.lane.b32.xlu1 %v2693_v45, %s2333_s26  ;;  %864 = vrot.lane.b32.xlu0 %v832_v46, %s2333_s26 }
  0x65   : > { %1995 = vmatpush3.msk.msra.mxu0 %vm1388_vm2, %v1338_v1  ;;  %2033 = vmatpush3.msk.msra.mxu1 %vm1388_vm2, %v1338_v1 }
  0x67   : > { %593 = vrot.lane.b32.xlu1 %v2693_v45, %s2330_s0  ;;  %577 = vrot.lane.b32.xlu0 %v832_v46, %s2330_s0 }
  0x6b   : > { %882 = vrot.lane.b32.xlu1 %v2701_v47, %s2333_s26  ;;  %866 = vrot.lane.b32.xlu0 %v833_v48, %s2333_s26 }
  0x6f   : > { %977 = vrot.lane.b32.xlu1 %v2706_v49, %s2334_s19  ;;  %961 = vrot.lane.b32.xlu0 %v929_v50, %s2334_s19 }
  0x73   : > { %595 = vrot.lane.b32.xlu1 %v2701_v47, %s2330_s0  ;;  %579 = vrot.lane.b32.xlu0 %v833_v48, %s2330_s0 }
  0x77   : > { %690 = vrot.lane.b32.xlu1 %v2706_v49, %s2331_s23  ;;  %674 = vrot.lane.b32.xlu0 %v929_v50, %s2331_s23 }
  0x7b   : > { %979 = vrot.lane.b32.xlu1 %v2717_v51, %s2334_s19  ;;  %963 = vrot.lane.b32.xlu0 %v930_v52, %s2334_s19 }
  0x7f   : > { %1075 = vrot.lane.b32.xlu1 %v2637_v31, %s2335_s10  ;;  %1059 = vrot.lane.b32.xlu0 %v2639_v32, %s2335_s10 }
  0x83   : > { %692 = vrot.lane.b32.xlu1 %v2717_v51, %s2331_s23  ;;  %676 = vrot.lane.b32.xlu0 %v930_v52, %s2331_s23 }
  0x87   : > { %787 = vrot.lane.b32.xlu1 %v2637_v31, %s2332_s24  ;;  %771 = vrot.lane.b32.xlu0 %v2639_v32, %s2332_s24 }
  0x8b   : > { %1077 = vrot.lane.b32.xlu1 %v2641_v33, %s2335_s10  ;;  %1061 = vrot.lane.b32.xlu0 %v2643_v34, %s2335_s10 }
  0x8f   : > { %1172 = vrot.lane.b32.xlu1 %v1132_v53, %s2336_s11  ;;  %1156 = vrot.lane.b32.xlu0 %v1124_v54, %s2336_s11 }
  0x93   : > { %789 = vrot.lane.b32.xlu1 %v2641_v33, %s2332_s24  ;;  %773 = vrot.lane.b32.xlu0 %v2643_v34, %s2332_s24 }
  0x97   : > { %884 = vrot.lane.b32.xlu1 %v1132_v53, %s2333_s26  ;;  %868 = vrot.lane.b32.xlu0 %v1124_v54, %s2333_s26 }
  0x9b   : > { %1174 = vrot.lane.b32.xlu1 %v1133_v55, %s2336_s11  ;;  %1158 = vrot.lane.b32.xlu0 %v1125_v56, %s2336_s11 }
  0x9f   : > { %1269 = vrot.lane.b32.xlu1 %v1229_v57, %s2337_s20  ;;  %1253 = vrot.lane.b32.xlu0 %v1221_v58, %s2337_s20 }
  0xa3   : > { %597 = vrot.lane.b32.xlu1 %v1132_v53, %s2330_s0  ;;  %581 = vrot.lane.b32.xlu0 %v1124_v54, %s2330_s0 }
  0xa7   : > { %886 = vrot.lane.b32.xlu1 %v1133_v55, %s2333_s26  ;;  %870 = vrot.lane.b32.xlu0 %v1125_v56, %s2333_s26 }
  0xab   : > { %981 = vrot.lane.b32.xlu1 %v1229_v57, %s2334_s19  ;;  %965 = vrot.lane.b32.xlu0 %v1221_v58, %s2334_s19 }
  0xaf   : > { %1271 = vrot.lane.b32.xlu1 %v1230_v2, %s2337_s20  ;;  %1255 = vrot.lane.b32.xlu0 %v1222_v3, %s2337_s20 }
  0xb3   : > { %599 = vrot.lane.b32.xlu1 %v1133_v55, %s2330_s0  ;;  %583 = vrot.lane.b32.xlu0 %v1125_v56, %s2330_s0  ;;  %v1039_v56 = vld [vmem:[#allocation2 + $0xc0] sm:$0xff] }
  0xb7   : > { %694 = vrot.lane.b32.xlu1 %v1229_v57, %s2331_s23  ;;  %678 = vrot.lane.b32.xlu0 %v1221_v58, %s2331_s23 }
  0xbb   : > { %983 = vrot.lane.b32.xlu1 %v1230_v2, %s2334_s19  ;;  %967 = vrot.lane.b32.xlu0 %v1222_v3, %s2334_s19 }
  0xbd   : > { %v576_v4 = vpop.permute.xlu1 %575  ;;  %v574_v5 = vpop.permute.xlu0 %573 }
  0xbe   : > { %623 = vst.msk [vmem:[#allocation3 + $0x8] sm:$0xff] %vm621_vm3, %v576_v4  ;;  %622 = vst.msk [vmem:[#allocation3] sm:$0xff] %vm621_vm3, %v574_v5 }
  0xbf   : > { %1079 = vrot.lane.b32.xlu1 %v2659_v39, %s2335_s10  ;;  %1063 = vrot.lane.b32.xlu0 %v2661_v40, %s2335_s10 }
  0xc1   : > { %v592_v6 = vpop.permute.xlu1 %591  ;;  %v590_v7 = vpop.permute.xlu0 %589 }
  0xc2   : > { %631 = vst.msk [vmem:[#allocation3 + $0x48] sm:$0xff] %vm621_vm3, %v592_v6  ;;  %630 = vst.msk [vmem:[#allocation3 + $0x40] sm:$0xff] %vm621_vm3, %v590_v7 }
  0xc3   : > { %696 = vrot.lane.b32.xlu1 %v1230_v2, %s2331_s23  ;;  %680 = vrot.lane.b32.xlu0 %v1222_v3, %s2331_s23  ;;  %v1136_v2 = vld [vmem:[#allocation2 + $0xc1] sm:$0xff] }
  0xc5   : > { %v687_v8 = vpop.permute.xlu1 %686  ;;  %v671_v9 = vpop.permute.xlu0 %670 }
  0xc6   : > { %727 = vst.msk [vmem:[#allocation3 + $0x40] sm:$0xff] %vm718_vm4, %v687_v8  ;;  %719 = vst.msk [vmem:[#allocation3] sm:$0xff] %vm718_vm4, %v671_v9  ;;  %v1137_v8 = vld [vmem:[#allocation2 + $0xc9] sm:$0xff] }
  0xc7   : > { %791 = vrot.lane.b32.xlu1 %v2659_v39, %s2332_s24  ;;  %775 = vrot.lane.b32.xlu0 %v2661_v40, %s2332_s24  ;;  %v1232_v40 = vld [vmem:[#allocation2 + $0xb2] sm:$0xff] }
  0xc9   : > { %v689_v10 = vpop.permute.xlu1 %688  ;;  %v673_v11 = vpop.permute.xlu0 %672 }
  0xca   : > { %728 = vst.msk [vmem:[#allocation3 + $0x48] sm:$0xff] %vm718_vm4, %v689_v10  ;;  %720 = vst.msk [vmem:[#allocation3 + $0x8] sm:$0xff] %vm718_vm4, %v673_v11 }
  0xcb   : > { %1081 = vrot.lane.b32.xlu1 %v2668_v43, %s2335_s10  ;;  %1065 = vrot.lane.b32.xlu0 %v2681_v44, %s2335_s10 }
  0xcd   : > { %v784_v14 = vpop.permute.xlu1 %783  ;;  %v768_v15 = vpop.permute.xlu0 %767 }
  0xce   : > { %824 = vst.msk [vmem:[#allocation3 + $0x40] sm:$0xff] %vm815_vm5, %v784_v14  ;;  %816 = vst.msk [vmem:[#allocation3] sm:$0xff] %vm815_vm5, %v768_v15 }
  0xcf   : > { %1176 = vrot.lane.b32.xlu1 %v1134_v12, %s2336_s11  ;;  %1160 = vrot.lane.b32.xlu0 %v1126_v13, %s2336_s11 }
  0xd1   : > { %v786_v16 = vpop.permute.xlu1 %785  ;;  %v770_v17 = vpop.permute.xlu0 %769 }
  0xd2   : > { %825 = vst.msk [vmem:[#allocation3 + $0x48] sm:$0xff] %vm815_vm5, %v786_v16  ;;  %817 = vst.msk [vmem:[#allocation3 + $0x8] sm:$0xff] %vm815_vm5, %v770_v17 }
  0xd3   : > { %793 = vrot.lane.b32.xlu1 %v2668_v43, %s2332_s24  ;;  %777 = vrot.lane.b32.xlu0 %v2681_v44, %s2332_s24  ;;  %v1224_v43 = vld [vmem:[#allocation2 + $0x52] sm:$0xff] }
  0xd5   : > { %v881_v18 = vpop.permute.xlu1 %880  ;;  %v865_v19 = vpop.permute.xlu0 %864 }
  0xd6   : > { %921 = vst.msk [vmem:[#allocation3 + $0x40] sm:$0xff] %vm912_vm6, %v881_v18  ;;  %913 = vst.msk [vmem:[#allocation3] sm:$0xff] %vm912_vm6, %v865_v19  ;;  %v1234_v18 = vld [vmem:[#allocation2 + $0xca] sm:$0xff] }
  0xd7   : > { %888 = vrot.lane.b32.xlu1 %v1134_v12, %s2333_s26  ;;  %872 = vrot.lane.b32.xlu0 %v1126_v13, %s2333_s26 }
  0xd9   : > { %v594_v22 = vpop.permute.xlu1 %593  ;;  %v578_v26 = vpop.permute.xlu0 %577 }
  0xda   : > { %632 = vst.msk [vmem:[#allocation3 + $0x50] sm:$0xff] %vm621_vm3, %v594_v22  ;;  %624 = vst.msk [vmem:[#allocation3 + $0x10] sm:$0xff] %vm621_vm3, %v578_v26  ;;  %v1041_v26 = vld [vmem:[#allocation2 + $0xd8] sm:$0xff] }
  0xdb   : > { %1178 = vrot.lane.b32.xlu1 %v1135_v20, %s2336_s11  ;;  %1162 = vrot.lane.b32.xlu0 %v1127_v21, %s2336_s11 }
  0xdd   : > { %v883_v31 = vpop.permute.xlu1 %882  ;;  %v867_v32 = vpop.permute.xlu0 %866 }
  0xde   : > { %922 = vst.msk [vmem:[#allocation3 + $0x48] sm:$0xff] %vm912_vm6, %v883_v31  ;;  %914 = vst.msk [vmem:[#allocation3 + $0x8] sm:$0xff] %vm912_vm6, %v867_v32  ;;  %v1042_v31 = vld [vmem:[#allocation2 + $0xe0] sm:$0xff] }
  0xdf   : > { %1273 = vrot.lane.b32.xlu1 %v1231_v28, %s2337_s20  ;;  %1257 = vrot.lane.b32.xlu0 %v1223_v30, %s2337_s20 }
  0xe1   : > { %v978_v33 = vpop.permute.xlu1 %977  ;;  %v962_v34 = vpop.permute.xlu0 %961 }
  0xe2   : > { %1018 = vst.msk [vmem:[#allocation3 + $0x40] sm:$0xff] %vm1009_vm7, %v978_v33  ;;  %1010 = vst.msk [vmem:[#allocation3] sm:$0xff] %vm1009_vm7, %v962_v34 }
  0xe3   : > { %601 = vrot.lane.b32.xlu1 %v1134_v12, %s2330_s0  ;;  %585 = vrot.lane.b32.xlu0 %v1126_v13, %s2330_s0 }
  0xe5   : > { %v596_v36 = vpop.permute.xlu1 %595  ;;  %v580_v37 = vpop.permute.xlu0 %579 }
  0xe6   : > { %633 = vst.msk [vmem:[#allocation3 + $0x58] sm:$0xff] %vm621_vm3, %v596_v36  ;;  %625 = vst.msk [vmem:[#allocation3 + $0x18] sm:$0xff] %vm621_vm3, %v580_v37 }
  0xe7   : > { %890 = vrot.lane.b32.xlu1 %v1135_v20, %s2333_s26  ;;  %874 = vrot.lane.b32.xlu0 %v1127_v21, %s2333_s26 }
  0xe9   : > { %v691_v38 = vpop.permute.xlu1 %690  ;;  %v675_v39 = vpop.permute.xlu0 %674 }
  0xea   : > { %729 = vst.msk [vmem:[#allocation3 + $0x50] sm:$0xff] %vm718_vm4, %v691_v38  ;;  %721 = vst.msk [vmem:[#allocation3 + $0x10] sm:$0xff] %vm718_vm4, %v675_v39 }
  0xeb   : > { %985 = vrot.lane.b32.xlu1 %v1231_v28, %s2334_s19  ;;  %969 = vrot.lane.b32.xlu0 %v1223_v30, %s2334_s19 }
  0xed   : > { %v980_v44 = vpop.permute.xlu1 %979  ;;  %v964_v46 = vpop.permute.xlu0 %963 }
  0xee   : > { %1019 = vst.msk [vmem:[#allocation3 + $0x48] sm:$0xff] %vm1009_vm7, %v980_v44  ;;  %1011 = vst.msk [vmem:[#allocation3 + $0x8] sm:$0xff] %vm1009_vm7, %v964_v46 }
  0xef   : > { %1275 = vrot.lane.b32.xlu1 %v1232_v40, %s2337_s20  ;;  %1259 = vrot.lane.b32.xlu0 %v1224_v43, %s2337_s20 }
  0xf1   : > { %v1076_v48 = vpop.permute.xlu1 %1075  ;;  %v1060_v50 = vpop.permute.xlu0 %1059 }
  0xf2   : > { %1116 = vst.msk [vmem:[#allocation3 + $0x40] sm:$0xff] %vm1107_vm8, %v1076_v48  ;;  %1108 = vst.msk [vmem:[#allocation3] sm:$0xff] %vm1107_vm8, %v1060_v50 }
  0xf3   : > { %603 = vrot.lane.b32.xlu1 %v1135_v20, %s2330_s0  ;;  %587 = vrot.lane.b32.xlu0 %v1127_v21, %s2330_s0 }
  0xf5   : > { %v693_v52 = vpop.permute.xlu1 %692  ;;  %v677_v53 = vpop.permute.xlu0 %676 }
  0xf6   : > { %730 = vst.msk [vmem:[#allocation3 + $0x58] sm:$0xff] %vm718_vm4, %v693_v52  ;;  %722 = vst.msk [vmem:[#allocation3 + $0x18] sm:$0xff] %vm718_vm4, %v677_v53 }
  0xf7   : > { %698 = vrot.lane.b32.xlu1 %v1231_v28, %s2331_s23  ;;  %682 = vrot.lane.b32.xlu0 %v1223_v30, %s2331_s23 }
  0xf9   : > { %v788_v54 = vpop.permute.xlu1 %787  ;;  %v772_v55 = vpop.permute.xlu0 %771 }
  0xfa   : > { %826 = vst.msk [vmem:[#allocation3 + $0x50] sm:$0xff] %vm815_vm5, %v788_v54  ;;  %818 = vst.msk [vmem:[#allocation3 + $0x10] sm:$0xff] %vm815_vm5, %v772_v55 }
  0xfb   : > { %987 = vrot.lane.b32.xlu1 %v1232_v40, %s2334_s19  ;;  %971 = vrot.lane.b32.xlu0 %v1224_v43, %s2334_s19 }
  0xfd   : > { %v1078_v57 = vpop.permute.xlu1 %1077  ;;  %v1062_v58 = vpop.permute.xlu0 %1061 }
  0xfe   : > { %1117 = vst.msk [vmem:[#allocation3 + $0x48] sm:$0xff] %vm1107_vm8, %v1078_v57  ;;  %1109 = vst.msk [vmem:[#allocation3 + $0x8] sm:$0xff] %vm1107_vm8, %v1062_v58 }
  0xff   : > { %1083 = vrot.lane.b32.xlu1 %v1039_v56, %s2335_s10  ;;  %1067 = vrot.lane.b32.xlu0 %v2666_v42, %s2335_s10 }
 0x101   : > { %v1173_v59 = vpop.permute.xlu1 %1172  ;;  %v1157_v60 = vpop.permute.xlu0 %1156 }
 0x102   : > { %1213 = vst.msk [vmem:[#allocation3 + $0x40] sm:$0xff] %vm1204_vm9, %v1173_v59  ;;  %1205 = vst.msk [vmem:[#allocation3] sm:$0xff] %vm1204_vm9, %v1157_v60 }
 0x103   : > { %700 = vrot.lane.b32.xlu1 %v1232_v40, %s2331_s23  ;;  %684 = vrot.lane.b32.xlu0 %v1224_v43, %s2331_s23 }
 0x105   : > { %v790_v61 = vpop.permute.xlu1 %789  ;;  %v774_v62 = vpop.permute.xlu0 %773 }
 0x106   : > { %827 = vst.msk [vmem:[#allocation3 + $0x58] sm:$0xff] %vm815_vm5, %v790_v61  ;;  %819 = vst.msk [vmem:[#allocation3 + $0x18] sm:$0xff] %vm815_vm5, %v774_v62 }
 0x107   : > { %795 = vrot.lane.b32.xlu1 %v1039_v56, %s2332_s24  ;;  %779 = vrot.lane.b32.xlu0 %v2666_v42, %s2332_s24 }
 0x109   : > { %v885_v0 = vpop.permute.xlu1 %884  ;;  %v869_v1 = vpop.permute.xlu0 %868 }
 0x10a   : > { %923 = vst.msk [vmem:[#allocation3 + $0x50] sm:$0xff] %vm912_vm6, %v885_v0  ;;  %915 = vst.msk [vmem:[#allocation3 + $0x10] sm:$0xff] %vm912_vm6, %v869_v1 }
 0x10b   : > { %1085 = vrot.lane.b32.xlu1 %v1040_v63, %s2335_s10  ;;  %1069 = vrot.lane.b32.xlu0 %v2664_v41, %s2335_s10 }
 0x10d   : > { %v1175_v3 = vpop.permute.xlu1 %1174  ;;  %v1159_v4 = vpop.permute.xlu0 %1158 }
 0x10e   : > { %1214 = vst.msk [vmem:[#allocation3 + $0x48] sm:$0xff] %vm1204_vm9, %v1175_v3  ;;  %1206 = vst.msk [vmem:[#allocation3 + $0x8] sm:$0xff] %vm1204_vm9, %v1159_v4 }
 0x10f   : > { %1180 = vrot.lane.b32.xlu1 %v1136_v2, %s2336_s11  ;;  %1164 = vrot.lane.b32.xlu0 %v2619_v24, %s2336_s11 }
 0x111   : > { %v1270_v42 = vpop.permute.xlu1 %1269  ;;  %v1254_v5 = vpop.permute.xlu0 %1253 }
 0x112   : > { %1310 = vst.msk [vmem:[#allocation3 + $0x40] sm:$0xff] %vm1301_vm10, %v1270_v42  ;;  %1302 = vst.msk [vmem:[#allocation3] sm:$0xff] %vm1301_vm10, %v1254_v5 }
 0x113   : > { %797 = vrot.lane.b32.xlu1 %v1040_v63, %s2332_s24  ;;  %781 = vrot.lane.b32.xlu0 %v2664_v41, %s2332_s24 }
 0x115   : > { %v598_v6 = vpop.permute.xlu1 %597  ;;  %v582_v7 = vpop.permute.xlu0 %581 }
 0x116   : > { %634 = vst.msk [vmem:[#allocation3 + $0x60] sm:$0xff] %vm621_vm3, %v598_v6  ;;  %626 = vst.msk [vmem:[#allocation3 + $0x20] sm:$0xff] %vm621_vm3, %v582_v7 }
 0x117   : > { %892 = vrot.lane.b32.xlu1 %v1136_v2, %s2333_s26  ;;  %876 = vrot.lane.b32.xlu0 %v2619_v24, %s2333_s26  ;;  %v1233_v24 = vld [vmem:[#allocation2 + $0xc2] sm:$0xff] }
 0x119   : > { %v887_v9 = vpop.permute.xlu1 %886  ;;  %v871_v10 = vpop.permute.xlu0 %870  ;;  %v1318_v11 = vld [vmem:[#allocation3] sm:$0xff] }
 0x11a   : > { %v1326_v12 = vld [vmem:[#allocation3 + $0x40] sm:$0xff]  ;;  %924 = vst.msk [vmem:[#allocation3 + $0x58] sm:$0xff] %vm912_vm6, %v887_v9  ;;  %916 = vst.msk [vmem:[#allocation3 + $0x18] sm:$0xff] %vm912_vm6, %v871_v10  ;;  %1996 = vmatprep.mubr.msk.f32.mxu0 %vm1339_vm11, %v1318_v11 }
 0x11b   : > { %2008 = vmatprep.mubr.msk.f32.mxu1 %vm1339_vm11, %v1326_v12  ;;  %1182 = vrot.lane.b32.xlu1 %v1137_v8, %s2336_s11 }
 0x11c   : > { %1166 = vrot.lane.b32.xlu0 %v2617_v23, %s2336_s11 }
 0x11d   : > { %v982_v41 = vpop.permute.xlu1 %981  ;;  %v966_v13 = vpop.permute.xlu0 %965 }
 0x11e   : > { %1020 = vst.msk [vmem:[#allocation3 + $0x50] sm:$0xff] %vm1009_vm7, %v982_v41  ;;  %1012 = vst.msk [vmem:[#allocation3 + $0x10] sm:$0xff] %vm1009_vm7, %v966_v13 }
 0x11f   : > { %1277 = vrot.lane.b32.xlu1 %v1233_v24, %s2337_s20 }
 0x120   : > { %1261 = vrot.lane.b32.xlu0 %v2635_v29, %s2337_s20 }
 0x121   : > { %v1272_v14 = vpop.permute.xlu1 %1271  ;;  %v1256_v15 = vpop.permute.xlu0 %1255 }
 0x122   : > { %1311 = vst.msk [vmem:[#allocation3 + $0x48] sm:$0xff] %vm1301_vm10, %v1272_v14  ;;  %1303 = vst.msk [vmem:[#allocation3 + $0x8] sm:$0xff] %vm1301_vm10, %v1256_v15 }
 0x123   : > { %894 = vrot.lane.b32.xlu1 %v1137_v8, %s2333_s26 }
 0x124   : > { %878 = vrot.lane.b32.xlu0 %v2617_v23, %s2333_s26 }
 0x125   : > { %v600_v16 = vpop.permute.xlu1 %599  ;;  %v584_v17 = vpop.permute.xlu0 %583 }
 0x126   : > { %635 = vst.msk [vmem:[#allocation3 + $0x68] sm:$0xff] %vm621_vm3, %v600_v16  ;;  %627 = vst.msk [vmem:[#allocation3 + $0x28] sm:$0xff] %vm621_vm3, %v584_v17 }
 0x127   : > { %989 = vrot.lane.b32.xlu1 %v1233_v24, %s2334_s19 }
 0x128   : > { %973 = vrot.lane.b32.xlu0 %v2635_v29, %s2334_s19 }
 0x129   : > { %v695_v19 = vpop.permute.xlu1 %694  ;;  %v679_v20 = vpop.permute.xlu0 %678  ;;  %v1319_v21 = vld [vmem:[#allocation3 + $0x8] sm:$0xff] }
 0x12a   : > { %v1327_v22 = vld [vmem:[#allocation3 + $0x48] sm:$0xff]  ;;  %731 = vst.msk [vmem:[#allocation3 + $0x60] sm:$0xff] %vm718_vm4, %v695_v19  ;;  %723 = vst.msk [vmem:[#allocation3 + $0x20] sm:$0xff] %vm718_vm4, %v679_v20  ;;  %1997 = vmatmul.mubr.msk.f32.vlgmr.msra.gmra.mrb[0].mxu0 %vm1339_vm11, %v1319_v21 }
 0x12b   : > { %2009 = vmatmul.mubr.msk.f32.vlgmr.msra.gmra.mrb[0].mxu1 %vm1339_vm11, %v1327_v22  ;;  %1279 = vrot.lane.b32.xlu1 %v1234_v18, %s2337_s20 }
 0x12c   : > { %1263 = vrot.lane.b32.xlu0 %v2656_v35, %s2337_s20 }
 0x12d   : > { %v984_v23 = vpop.permute.xlu1 %983  ;;  %v968_v29 = vpop.permute.xlu0 %967 }
 0x12e   : > { %1021 = vst.msk [vmem:[#allocation3 + $0x58] sm:$0xff] %vm1009_vm7, %v984_v23  ;;  %1013 = vst.msk [vmem:[#allocation3 + $0x18] sm:$0xff] %vm1009_vm7, %v968_v29 }
 0x12f   : > { %991 = vrot.lane.b32.xlu1 %v1234_v18, %s2334_s19 }
 0x130   : > { %975 = vrot.lane.b32.xlu0 %v2656_v35, %s2334_s19  ;;  %v1138_v35 = vld [vmem:[#allocation2 + $0xd9] sm:$0xff] }
 0x131   : > { %v1080_v28 = vpop.permute.xlu1 %1079  ;;  %v1064_v30 = vpop.permute.xlu0 %1063 }
 0x132   : > { %1118 = vst.msk [vmem:[#allocation3 + $0x50] sm:$0xff] %vm1107_vm8, %v1080_v28  ;;  %1110 = vst.msk [vmem:[#allocation3 + $0x10] sm:$0xff] %vm1107_vm8, %v1064_v30 }
 0x133   : > { %1087 = vrot.lane.b32.xlu1 %v1041_v26, %s2335_s10 }
 0x134   : > { %1071 = vrot.lane.b32.xlu0 %v2621_v25, %s2335_s10  ;;  %v1139_v25 = vld [vmem:[#allocation2 + $0xe1] sm:$0xff] }
 0x135   : > { %v697_v32 = vpop.permute.xlu1 %696  ;;  %v681_v33 = vpop.permute.xlu0 %680 }
 0x136   : > { %732 = vst.msk [vmem:[#allocation3 + $0x68] sm:$0xff] %vm718_vm4, %v697_v32  ;;  %724 = vst.msk [vmem:[#allocation3 + $0x28] sm:$0xff] %vm718_vm4, %v681_v33 }
 0x137   : > { %1089 = vrot.lane.b32.xlu1 %v1042_v31, %s2335_s10 }
 0x138   : > { %1073 = vrot.lane.b32.xlu0 %v2623_v27, %s2335_s10  ;;  %v1235_v27 = vld [vmem:[#allocation2 + $0xda] sm:$0xff] }
 0x139   : > { %v792_v34 = vpop.permute.xlu1 %791  ;;  %v776_v36 = vpop.permute.xlu0 %775 }
 0x13a   : > { %828 = vst.msk [vmem:[#allocation3 + $0x60] sm:$0xff] %vm815_vm5, %v792_v34  ;;  %820 = vst.msk [vmem:[#allocation3 + $0x20] sm:$0xff] %vm815_vm5, %v776_v36 }
 0x13b   : > { %1184 = vrot.lane.b32.xlu1 %v1138_v35, %s2336_s11 }
 0x13c   : > { %1168 = vrot.lane.b32.xlu0 %v2693_v45, %s2336_s11  ;;  %v1236_v45 = vld [vmem:[#allocation2 + $0xe2] sm:$0xff] }
 0x13d   : > { %v1082_v37 = vpop.permute.xlu1 %1081  ;;  %v1066_v38 = vpop.permute.xlu0 %1065 }
 0x13e   : > { %1119 = vst.msk [vmem:[#allocation3 + $0x58] sm:$0xff] %vm1107_vm8, %v1082_v37  ;;  %1111 = vst.msk [vmem:[#allocation3 + $0x18] sm:$0xff] %vm1107_vm8, %v1066_v38 }
 0x13f   : > { %1186 = vrot.lane.b32.xlu1 %v1139_v25, %s2336_s11 }
 0x140   : > { %1170 = vrot.lane.b32.xlu0 %v2701_v47, %s2336_s11 }
 0x141   : > { %v1177_v39 = vpop.permute.xlu1 %1176  ;;  %v1161_v40 = vpop.permute.xlu0 %1160 }
 0x142   : > { %1215 = vst.msk [vmem:[#allocation3 + $0x50] sm:$0xff] %vm1204_vm9, %v1177_v39  ;;  %1207 = vst.msk [vmem:[#allocation3 + $0x10] sm:$0xff] %vm1204_vm9, %v1161_v40 }
 0x143   : > { %1281 = vrot.lane.b32.xlu1 %v1235_v27, %s2337_s20 }
 0x144   : > { %1265 = vrot.lane.b32.xlu0 %v2706_v49, %s2337_s20 }
 0x145   : > { %v794_v43 = vpop.permute.xlu1 %793  ;;  %v778_v44 = vpop.permute.xlu0 %777 }
 0x146   : > { %829 = vst.msk [vmem:[#allocation3 + $0x68] sm:$0xff] %vm815_vm5, %v794_v43  ;;  %821 = vst.msk [vmem:[#allocation3 + $0x28] sm:$0xff] %vm815_vm5, %v778_v44 }
 0x147   : > { %1283 = vrot.lane.b32.xlu1 %v1236_v45, %s2337_s20 }
 0x148   : > { %1267 = vrot.lane.b32.xlu0 %v2717_v51, %s2337_s20 }
 0x149   : > { %v889_v47 = vpop.permute.xlu1 %888  ;;  %v873_v46 = vpop.permute.xlu0 %872 }
 0x14a   : > { %925 = vst.msk [vmem:[#allocation3 + $0x60] sm:$0xff] %vm912_vm6, %v889_v47  ;;  %917 = vst.msk [vmem:[#allocation3 + $0x20] sm:$0xff] %vm912_vm6, %v873_v46 }
 0x14d   : > { %v1179_v48 = vpop.permute.xlu1 %1178  ;;  %v1163_v49 = vpop.permute.xlu0 %1162 }
 0x14e   : > { %1216 = vst.msk [vmem:[#allocation3 + $0x58] sm:$0xff] %vm1204_vm9, %v1179_v48  ;;  %1208 = vst.msk [vmem:[#allocation3 + $0x18] sm:$0xff] %vm1204_vm9, %v1163_v49 }
 0x151   : > { %v1274_v50 = vpop.permute.xlu1 %1273  ;;  %v1258_v52 = vpop.permute.xlu0 %1257 }
 0x152   : > { %1312 = vst.msk [vmem:[#allocation3 + $0x50] sm:$0xff] %vm1301_vm10, %v1274_v50  ;;  %1304 = vst.msk [vmem:[#allocation3 + $0x10] sm:$0xff] %vm1301_vm10, %v1258_v52 }
 0x155   : > { %v602_v53 = vpop.permute.xlu1 %601  ;;  %v586_v51 = vpop.permute.xlu0 %585 }
 0x156   : > { %636 = vst.msk [vmem:[#allocation3 + $0x70] sm:$0xff] %vm621_vm3, %v602_v53  ;;  %628 = vst.msk [vmem:[#allocation3 + $0x30] sm:$0xff] %vm621_vm3, %v586_v51 }
 0x159   : > { %v891_v54 = vpop.permute.xlu1 %890  ;;  %v875_v55 = vpop.permute.xlu0 %874  ;;  %v1320_v56 = vld [vmem:[#allocation3 + $0x10] sm:$0xff] }
 0x15a   : > { %v1328_v57 = vld [vmem:[#allocation3 + $0x50] sm:$0xff]  ;;  %926 = vst.msk [vmem:[#allocation3 + $0x68] sm:$0xff] %vm912_vm6, %v891_v54  ;;  %918 = vst.msk [vmem:[#allocation3 + $0x28] sm:$0xff] %vm912_vm6, %v875_v55  ;;  %1999 = vmatprep.mubr.msk.f32.mxu0 %vm1339_vm11, %v1320_v56 }
 0x15b   : > { %2011 = vmatprep.mubr.msk.f32.mxu1 %vm1339_vm11, %v1328_v57 }
 0x15d   : > { %v986_v58 = vpop.permute.xlu1 %985  ;;  %v970_v59 = vpop.permute.xlu0 %969 }
 0x15e   : > { %1022 = vst.msk [vmem:[#allocation3 + $0x60] sm:$0xff] %vm1009_vm7, %v986_v58  ;;  %1014 = vst.msk [vmem:[#allocation3 + $0x20] sm:$0xff] %vm1009_vm7, %v970_v59 }
 0x161   : > { %v1276_v60 = vpop.permute.xlu1 %1275  ;;  %v1260_v61 = vpop.permute.xlu0 %1259 }
 0x162   : > { %1313 = vst.msk [vmem:[#allocation3 + $0x58] sm:$0xff] %vm1301_vm10, %v1276_v60  ;;  %1305 = vst.msk [vmem:[#allocation3 + $0x18] sm:$0xff] %vm1301_vm10, %v1260_v61 }
 0x165   : > { %v604_v62 = vpop.permute.xlu1 %603  ;;  %v588_v63 = vpop.permute.xlu0 %587 }
 0x166   : > { %637 = vst.msk [vmem:[#allocation3 + $0x78] sm:$0xff] %vm621_vm3, %v604_v62  ;;  %629 = vst.msk [vmem:[#allocation3 + $0x38] sm:$0xff] %vm621_vm3, %v588_v63 }
 0x169   : > { %v699_v0 = vpop.permute.xlu1 %698  ;;  %v683_v1 = vpop.permute.xlu0 %682  ;;  %v1321_v2 = vld [vmem:[#allocation3 + $0x18] sm:$0xff] }
 0x16a   : > { %v1329_v3 = vld [vmem:[#allocation3 + $0x58] sm:$0xff]  ;;  %733 = vst.msk [vmem:[#allocation3 + $0x70] sm:$0xff] %vm718_vm4, %v699_v0  ;;  %725 = vst.msk [vmem:[#allocation3 + $0x30] sm:$0xff] %vm718_vm4, %v683_v1  ;;  %2000 = vmatmul.mubr.msk.f32.gmra.mrb[2].mxu0 %vm1339_vm11, %v1321_v2 }
 0x16b   : > { %2012 = vmatmul.mubr.msk.f32.gmra.mrb[2].mxu1 %vm1339_vm11, %v1329_v3 }
 0x16d   : > { %v988_v4 = vpop.permute.xlu1 %987  ;;  %v972_v42 = vpop.permute.xlu0 %971 }
 0x16e   : > { %1023 = vst.msk [vmem:[#allocation3 + $0x68] sm:$0xff] %vm1009_vm7, %v988_v4  ;;  %1015 = vst.msk [vmem:[#allocation3 + $0x28] sm:$0xff] %vm1009_vm7, %v972_v42  ;;  %v2338_v4 = vmov (!%p1955_p0), 0.0  }
 0x16f   : > { %1542 = vst.msk [vmem:[%s2603_s29] sm:$0x1] (!%p1955_p0), %vm1541_vm12, %v2338_v4  ;;  %1543 = vst.msk [vmem:[%s2607_s18] sm:$0x1] (!%p1955_p0), %vm1541_vm12, %v2338_v4 }
 0x171   : > { %v1084_v5 = vpop.permute.xlu1 %1083  ;;  %v1068_v6 = vpop.permute.xlu0 %1067 }
 0x172   : > { %1120 = vst.msk [vmem:[#allocation3 + $0x60] sm:$0xff] %vm1107_vm8, %v1084_v5  ;;  %1112 = vst.msk [vmem:[#allocation3 + $0x20] sm:$0xff] %vm1107_vm8, %v1068_v6 }
 0x175   : > { %v701_v7 = vpop.permute.xlu1 %700  ;;  %v685_v8 = vpop.permute.xlu0 %684 }
 0x176   : > { %734 = vst.msk [vmem:[#allocation3 + $0x78] sm:$0xff] %vm718_vm4, %v701_v7  ;;  %726 = vst.msk [vmem:[#allocation3 + $0x38] sm:$0xff] %vm718_vm4, %v685_v8 }
 0x179   : > { %v796_v9 = vpop.permute.xlu1 %795  ;;  %v780_v10 = vpop.permute.xlu0 %779 }
 0x17a   : > { %830 = vst.msk [vmem:[#allocation3 + $0x70] sm:$0xff] %vm815_vm5, %v796_v9  ;;  %822 = vst.msk [vmem:[#allocation3 + $0x30] sm:$0xff] %vm815_vm5, %v780_v10 }
 0x17d   : > { %v1086_v11 = vpop.permute.xlu1 %1085  ;;  %v1070_v12 = vpop.permute.xlu0 %1069 }
 0x17e   : > { %1121 = vst.msk [vmem:[#allocation3 + $0x68] sm:$0xff] %vm1107_vm8, %v1086_v11  ;;  %1113 = vst.msk [vmem:[#allocation3 + $0x28] sm:$0xff] %vm1107_vm8, %v1070_v12 }
 0x181   : > { %v1181_v24 = vpop.permute.xlu1 %1180  ;;  %v1165_v41 = vpop.permute.xlu0 %1164 }
 0x182   : > { %1217 = vst.msk [vmem:[#allocation3 + $0x60] sm:$0xff] %vm1204_vm9, %v1181_v24  ;;  %1209 = vst.msk [vmem:[#allocation3 + $0x20] sm:$0xff] %vm1204_vm9, %v1165_v41 }
 0x185   : > { %v798_v13 = vpop.permute.xlu1 %797  ;;  %v782_v14 = vpop.permute.xlu0 %781 }
 0x186   : > { %831 = vst.msk [vmem:[#allocation3 + $0x78] sm:$0xff] %vm815_vm5, %v798_v13  ;;  %823 = vst.msk [vmem:[#allocation3 + $0x38] sm:$0xff] %vm815_vm5, %v782_v14 }
 0x189   : > { %v893_v15 = vpop.permute.xlu1 %892  ;;  %v877_v16 = vpop.permute.xlu0 %876 }
 0x18a   : > { %927 = vst.msk [vmem:[#allocation3 + $0x70] sm:$0xff] %vm912_vm6, %v893_v15  ;;  %919 = vst.msk [vmem:[#allocation3 + $0x30] sm:$0xff] %vm912_vm6, %v877_v16 }
 0x18d   : > { %v1183_v17 = vpop.permute.xlu1 %1182 }
 0x18e   : > { %v1167_v18 = vpop.permute.xlu0 %1166  ;;  %1218 = vst.msk [vmem:[#allocation3 + $0x68] sm:$0xff] %vm1204_vm9, %v1183_v17 }
 0x18f   : > { %1210 = vst.msk [vmem:[#allocation3 + $0x28] sm:$0xff] %vm1204_vm9, %v1167_v18 }
 0x191   : > { %v1278_v19 = vpop.permute.xlu1 %1277 }
 0x192   : > { %v1262_v20 = vpop.permute.xlu0 %1261  ;;  %1314 = vst.msk [vmem:[#allocation3 + $0x60] sm:$0xff] %vm1301_vm10, %v1278_v19 }
 0x193   : > { %1306 = vst.msk [vmem:[#allocation3 + $0x20] sm:$0xff] %vm1301_vm10, %v1262_v20 }
 0x195   : > { %v895_v21 = vpop.permute.xlu1 %894 }
 0x196   : > { %v879_v22 = vpop.permute.xlu0 %878  ;;  %928 = vst.msk [vmem:[#allocation3 + $0x78] sm:$0xff] %vm912_vm6, %v895_v21 }
 0x197   : > { %920 = vst.msk [vmem:[#allocation3 + $0x38] sm:$0xff] %vm912_vm6, %v879_v22 }
 0x199   : > { %v990_v23 = vpop.permute.xlu1 %989  ;;  %v1330_v28 = vld [vmem:[#allocation3 + $0x60] sm:$0xff] }
 0x19a   : > { %v974_v29 = vpop.permute.xlu0 %973  ;;  %v1322_v26 = vld [vmem:[#allocation3 + $0x20] sm:$0xff]  ;;  %1024 = vst.msk [vmem:[#allocation3 + $0x70] sm:$0xff] %vm1009_vm7, %v990_v23  ;;  %2014 = vmatprep.mubr.msk.f32.mxu1 %vm1339_vm11, %v1330_v28 }
 0x19b   : > { %1016 = vst.msk [vmem:[#allocation3 + $0x30] sm:$0xff] %vm1009_vm7, %v974_v29  ;;  %2002 = vmatprep.mubr.msk.f32.mxu0 %vm1339_vm11, %v1322_v26 }
 0x19d   : > { %v1280_v30 = vpop.permute.xlu1 %1279 }
 0x19e   : > { %v1264_v31 = vpop.permute.xlu0 %1263  ;;  %1315 = vst.msk [vmem:[#allocation3 + $0x68] sm:$0xff] %vm1301_vm10, %v1280_v30 }
 0x19f   : > { %1307 = vst.msk [vmem:[#allocation3 + $0x28] sm:$0xff] %vm1301_vm10, %v1264_v31 }
 0x1a1   : > { %v992_v32 = vpop.permute.xlu1 %991 }
 0x1a2   : > { %v976_v33 = vpop.permute.xlu0 %975  ;;  %1025 = vst.msk [vmem:[#allocation3 + $0x78] sm:$0xff] %vm1009_vm7, %v992_v32 }
 0x1a3   : > { %1017 = vst.msk [vmem:[#allocation3 + $0x38] sm:$0xff] %vm1009_vm7, %v976_v33 }
 0x1a5   : > { %v1088_v35 = vpop.permute.xlu1 %1087  ;;  %v1331_v25 = vld [vmem:[#allocation3 + $0x68] sm:$0xff] }
 0x1a6   : > { %v1072_v34 = vpop.permute.xlu0 %1071  ;;  %v1323_v36 = vld [vmem:[#allocation3 + $0x28] sm:$0xff]  ;;  %1122 = vst.msk [vmem:[#allocation3 + $0x70] sm:$0xff] %vm1107_vm8, %v1088_v35  ;;  %2015 = vmatmul.mubr.msk.f32.gmra.mrb[4].mxu1 %vm1339_vm11, %v1331_v25 }
 0x1a7   : > { %1114 = vst.msk [vmem:[#allocation3 + $0x30] sm:$0xff] %vm1107_vm8, %v1072_v34  ;;  %2003 = vmatmul.mubr.msk.f32.gmra.mrb[4].mxu0 %vm1339_vm11, %v1323_v36 }
 0x1a9   : > { %v1090_v37 = vpop.permute.xlu1 %1089 }
 0x1aa   : > { %v1074_v38 = vpop.permute.xlu0 %1073  ;;  %1123 = vst.msk [vmem:[#allocation3 + $0x78] sm:$0xff] %vm1107_vm8, %v1090_v37 }
 0x1ab   : > { %1115 = vst.msk [vmem:[#allocation3 + $0x38] sm:$0xff] %vm1107_vm8, %v1074_v38 }
 0x1ad   : > { %v1185_v27 = vpop.permute.xlu1 %1184 }
 0x1ae   : > { %v1169_v39 = vpop.permute.xlu0 %1168  ;;  %1219 = vst.msk [vmem:[#allocation3 + $0x70] sm:$0xff] %vm1204_vm9, %v1185_v27 }
 0x1af   : > { %1211 = vst.msk [vmem:[#allocation3 + $0x30] sm:$0xff] %vm1204_vm9, %v1169_v39 }
 0x1b1   : > { %v1187_v40 = vpop.permute.xlu1 %1186 }
 0x1b2   : > { %v1171_v45 = vpop.permute.xlu0 %1170  ;;  %1220 = vst.msk [vmem:[#allocation3 + $0x78] sm:$0xff] %vm1204_vm9, %v1187_v40 }
 0x1b3   : > { %1212 = vst.msk [vmem:[#allocation3 + $0x38] sm:$0xff] %vm1204_vm9, %v1171_v45 }
 0x1b5   : > { %v1282_v43 = vpop.permute.xlu1 %1281 }
 0x1b6   : > { %v1266_v44 = vpop.permute.xlu0 %1265  ;;  %1316 = vst.msk [vmem:[#allocation3 + $0x70] sm:$0xff] %vm1301_vm10, %v1282_v43 }
 0x1b7   : > { %1308 = vst.msk [vmem:[#allocation3 + $0x30] sm:$0xff] %vm1301_vm10, %v1266_v44 }
 0x1b9   : > { %v1284_v47 = vpop.permute.xlu1 %1283 }
 0x1ba   : > { %v1268_v46 = vpop.permute.xlu0 %1267  ;;  %1317 = vst.msk [vmem:[#allocation3 + $0x78] sm:$0xff] %vm1301_vm10, %v1284_v47 }
 0x1bb   : > { %1309 = vst.msk [vmem:[#allocation3 + $0x38] sm:$0xff] %vm1301_vm10, %v1268_v46 }
 0x1bd   : > { %v1332_v49 = vld [vmem:[#allocation3 + $0x70] sm:$0xff] }
 0x1be   : > { %v1324_v48 = vld [vmem:[#allocation3 + $0x30] sm:$0xff]  ;;  %2017 = vmatprep.mubr.msk.f32.mxu1 %vm1339_vm11, %v1332_v49 }
 0x1bf   : > { %2005 = vmatprep.mubr.msk.f32.mxu0 %vm1339_vm11, %v1324_v48 }
 0x1c1   : > { %v1333_v52 = vld [vmem:[#allocation3 + $0x78] sm:$0xff] }
 0x1c2   : > { %v1325_v50 = vld [vmem:[#allocation3 + $0x38] sm:$0xff]  ;;  %2018 = vmatmul.mubr.msk.f32.gmra.mrb[6].mxu1 %vm1339_vm11, %v1333_v52 }
 0x1c3   : > { %2006 = vmatmul.mubr.msk.f32.gmra.mrb[6].mxu0 %vm1339_vm11, %v1325_v50 }
 0x1fd   : > { %v1998_v53 = vpop.f32.mrb[0].mxu0 }
 0x1fe   : > { %v3018_v51 = vpop.f32.mrb[0].mxu1  ;;  %v1458_v54 = vpop.f32.mrb[1].mxu0 }
 0x1ff   : > { %v3020_v55 = vpop.f32.mrb[1].mxu1 }
 0x23d   : > { %v2001_v56 = vpop.f32.mrb[2].mxu0 }
 0x23e   : > { %v3022_v57 = vpop.f32.mrb[2].mxu1  ;;  %v1468_v58 = vpop.f32.mrb[3].mxu0 }
 0x23f   : > { %v3024_v59 = vpop.f32.mrb[3].mxu1 }
 0x279   : > { %v3028_v61 = vpop.f32.mrb[4].mxu1 }
 0x27a   : > { %v3026_v60 = vpop.f32.mrb[4].mxu0  ;;  %v3030_v63 = vpop.f32.mrb[5].mxu1 }
 0x27b   : > { %v1478_v62 = vpop.f32.mrb[5].mxu0 }
 0x291   : > { %1540 = sbr.rel (%p1955_p0) target bundleno = 664 (0x298), region = 48 }
 0x295   : > { %v3034_v1 = vpop.f32.mrb[6].mxu1 }
 0x296   : > { %v3032_v0 = vpop.f32.mrb[6].mxu0  ;;  %v3038_v3 = vpop.f32.mrb[7].mxu1 }
 0x297   : > { %v3036_v2 = vpop.f32.mrb[7].mxu0 }
 0x298 PF: > { %1642 = vxpose.xlu0.b32.start [1/16] (narrow) %v1458_v54, 8  ;;  %vm1545_vm13 = vcmask 64512   ;;  %v1587_v11 = vmul.f32 %v1458_v54, %v1458_v54  ;;  %v1588_v12 = vmul.f32 %v1998_v53, %v1998_v53  ;;  %v1589_v41 = vmul.f32 %v1468_v58, %v1468_v58  ;;  %s3311_s0 = sadd.s32 4294967295, %s2327_s7   ;;  %s1959_s24 = sshll.u32 %s2315_s28, 4 }
 0x299   : > { %v1546_v42 = vsel %vm1545_vm13, %v1458_v54, 0.0  ;;  %v1547_v5 = vsel %vm1545_vm13, %v1998_v53, 0.0  ;;  %v1549_v6 = vsel %vm1545_vm13, %v1468_v58, 0.0  ;;  %v1551_v8 = vsel %vm1545_vm13, %v2001_v56, 0.0  ;;  %s3116_s23 = sand.u32 1, %s3311_s0   ;;  %s1712_s26 = sshll.u32 %s2603_s29, 4  ;;  %s3129_s26 = int_to_ptr.vmem [resolvable:$true] %s1712_s26 }
 0x29a   : > { %v1548_v7 = vadd.f32 %v1547_v5, %v1546_v42  ;;  %v1553_v10 = vsel %vm1545_vm13, %v1478_v62, 0.0  ;;  %v1555_v13 = vsel %vm1545_vm13, %v3026_v60, 0.0  ;;  %v1590_v14 = vmul.f32 %v2001_v56, %v2001_v56  ;;  %s3127_s11 = scalar_lea.hbm %s3273_s5, %s1959_s24  ;;  %s1681_s17 = scalar_lea.sflag [#allocation7], %s3116_s23 }
 0x29b   : > { %v1557_v16 = vsel %vm1545_vm13, %v3036_v2, 0.0  ;;  %v1591_v17 = vmul.f32 %v1478_v62, %v1478_v62  ;;  %v1603_v18 = vsel %vm1545_vm13, %v1587_v11, 0.0  ;;  %v1604_v19 = vsel %vm1545_vm13, %v1588_v12, 0.0  ;;  %s2149_s20 = scalar_lea.vmem %s3129_s26, 16  ;;  %s2339_s12 = smov [#allocation6]  }
 0x29c   : > { %1643 = vxpose.xlu0.b32.cont [2/16] (narrow) %v1998_v53, 8  ;;  %v1550_v9 = vadd.f32 %v1549_v6, %v1548_v7  ;;  %v1605_v21 = vadd.f32 %v1604_v19, %v1603_v18  ;;  %v1606_v22 = vsel %vm1545_vm13, %v1589_v41, 0.0  ;;  %v1559_v23 = vsel %vm1545_vm13, %v3032_v0, 0.0  ;;  %p2150_p1 = scmp.ne.s32.totalorder %s3129_s26, %s2149_s20  ;;  %s2153_s15 = sshll.u32 %s2339_s12, 4  ;;  %s2154_s15 = int_to_ptr.vmem [resolvable:$false] %s2153_s15 }
 0x29d   : > { %v1592_v29 = vmul.f32 %v3026_v60, %v3026_v60  ;;  %v1608_v26 = vsel %vm1545_vm13, %v1590_v14, 0.0  ;;  %v1561_v31 = vsel %vm1545_vm13, %v3020_v55, 0.0  ;;  %v1593_v32 = vmul.f32 %v3036_v2, %v3036_v2  ;;  %s2155_s8 = scalar_lea.vmem %s2154_s15, 32  ;;  %p2156_p4 = scmp.lt.s32.totalorder %s3129_s26, %s2154_s15 }
 0x29e   : > { %v1552_v24 = vadd.f32 %v1551_v8, %v1550_v9  ;;  %v1607_v30 = vadd.f32 %v1606_v22, %v1605_v21  ;;  %v1610_v33 = vsel %vm1545_vm13, %v1591_v17, 0.0  ;;  %v1563_v36 = vsel %vm1545_vm13, %v3018_v51, 0.0  ;;  %p2151_p3 = pnand %p2150_p1, %p2489_p12  ;;  %p2157_p6 = scmp.lt.s32.totalorder %s2155_s8, %s2149_s20 }
 0x29f   : > { %v1594_v25 = vmul.f32 %v3032_v0, %v3032_v0  ;;  %v1612_v37 = vsel %vm1545_vm13, %v1592_v29, 0.0  ;;  %v1565_v39 = vsel %vm1545_vm13, %v3024_v59, 0.0  ;;  %v1595_v40 = vmul.f32 %v3020_v55, %v3020_v55 }
 0x2a0   : > { %1644 = vxpose.xlu0.b32.cont [3/16] (narrow) %v1468_v58, 8  ;;  %v1554_v15 = vadd.f32 %v1553_v10, %v1552_v24  ;;  %v1609_v34 = vadd.f32 %v1608_v26, %v1607_v30  ;;  %v1614_v45 = vsel %vm1545_vm13, %v1593_v32, 0.0  ;;  %v1567_v47 = vsel %vm1545_vm13, %v3022_v57, 0.0  ;;  %v1544_v32 = vld [vmem:[%s2603_s29] sm:$0x1]  ;;  %p2152_p2 = pneg %p2151_p3  ;;  %p2158_p8 = por %p2157_p6, %p2156_p4 }
 0x2a1   : > { %v1596_v46 = vmul.f32 %v3018_v51, %v3018_v51  ;;  %v1616_v48 = vsel %vm1545_vm13, %v1594_v25, 0.0  ;;  %v1569_v52 = vsel %vm1545_vm13, %v3030_v63, 0.0  ;;  %v1597_v53 = vmul.f32 %v3024_v59, %v3024_v59 }
 0x2a2   : > { %v1556_v20 = vadd.f32 %v1555_v13, %v1554_v15  ;;  %v1611_v27 = vadd.f32 %v1610_v33, %v1609_v34  ;;  %v1618_v54 = vsel %vm1545_vm13, %v1595_v40, 0.0  ;;  %v1598_v4 = vmul.f32 %v3022_v57, %v3022_v57  ;;  %p2159_p9 = pnand %p2158_p8, %p2152_p2 }
 0x2a3   : > { %v1573_v6 = vsel %vm1545_vm13, %v3038_v3, 0.0  ;;  %v1599_v7 = vmul.f32 %v3030_v63, %v3030_v63  ;;  %v1622_v8 = vsel %vm1545_vm13, %v1597_v53, 0.0  ;;  %v1575_v11 = vsel %vm1545_vm13, %v3034_v1, 0.0 }
 0x2a4   : > { %1645 = vxpose.xlu0.b32.cont [4/16] (narrow) %v2001_v56, 8  ;;  %v1558_v28 = vadd.f32 %v1557_v16, %v1556_v20  ;;  %v1613_v44 = vadd.f32 %v1612_v37, %v1611_v27  ;;  %v1600_v12 = vmul.f32 %v3028_v61, %v3028_v61  ;;  %v1601_v13 = vmul.f32 %v3038_v3, %v3038_v3 }
 0x2a5   : > { %v1626_v14 = vsel %vm1545_vm13, %v1599_v7, 0.0  ;;  %v1602_v17 = vmul.f32 %v3034_v1, %v3034_v1  ;;  %vm1584_vm14 = vcmask 57344  }
 0x2a6   : > { %v1560_v35 = vadd.f32 %v1559_v23, %v1558_v28  ;;  %v1615_v50 = vadd.f32 %v1614_v45, %v1613_v44  ;;  %v1628_v18 = vsel %vm1545_vm13, %v1600_v12, 0.0  ;;  %v1630_v20 = vsel %vm1545_vm13, %v1601_v13, 0.0 }
 0x2a7   : > { %v1632_v23 = vsel %vm1545_vm13, %v1602_v17, 0.0 }
 0x2a8   : > { %1646 = vxpose.xlu0.b32.cont [5/16] (narrow) %v1478_v62, 8  ;;  %v1562_v38 = vadd.f32 %v1561_v31, %v1560_v35  ;;  %v1617_v58 = vadd.f32 %v1616_v48, %v1615_v50  ;;  %v1571_v62 = vsel %vm1545_vm13, %v3028_v61, 0.0 }
 0x2aa   : > { %v1564_v43 = vadd.f32 %v1563_v36, %v1562_v38  ;;  %v1619_v5 = vadd.f32 %v1618_v54, %v1617_v58 }
 0x2ac   : > { %1647 = vxpose.xlu0.b32.cont [6/16] (narrow) %v3026_v60, 8  ;;  %v1566_v49 = vadd.f32 %v1565_v39, %v1564_v43  ;;  %v1620_v60 = vsel %vm1545_vm13, %v1596_v46, 0.0 }
 0x2ad   : > { %v1621_v10 = vadd.f32 %v1620_v60, %v1619_v5 }
 0x2ae   : > { %v1568_v56 = vadd.f32 %v1567_v47, %v1566_v49 }
 0x2af   : > { %v1623_v41 = vadd.f32 %v1622_v8, %v1621_v10 }
 0x2b0   : > { %1648 = vxpose.xlu0.b32.cont [7/16] (narrow) %v3036_v2, 8  ;;  %v1570_v42 = vadd.f32 %v1569_v52, %v1568_v56  ;;  %v1624_v2 = vsel %vm1545_vm13, %v1598_v4, 0.0 }
 0x2b1   : > { %v1625_v16 = vadd.f32 %v1624_v2, %v1623_v41 }
 0x2b2   : > { %v1572_v9 = vadd.f32 %v1571_v62, %v1570_v42 }
 0x2b4   : > { %1649 = vxpose.xlu0.b32.cont [8/16] (narrow) %v3032_v0, 8  ;;  %v1574_v24 = vadd.f32 %v1573_v6, %v1572_v9  ;;  %v1627_v0 = vadd.f32 %v1626_v14, %v1625_v16 }
 0x2b6   : > { %v1576_v15 = vadd.f32 %v1575_v11, %v1574_v24  ;;  %v1629_v22 = vadd.f32 %v1628_v18, %v1627_v0 }
 0x2b8   : > { %1650 = vxpose.xlu0.b32.cont [9/16] (narrow) %v3020_v55, 8  ;;  %v1577_v19 = vrot.slane %v1576_v15, 4  ;;  %v1631_v26 = vadd.f32 %v1630_v20, %v1629_v22 }
 0x2ba   : > { %v1578_v21 = vadd.f32 %v1577_v19, %v1576_v15  ;;  %v1633_v30 = vadd.f32 %v1632_v23, %v1631_v26 }
 0x2bc   : > { %1651 = vxpose.xlu0.b32.cont [10/16] (narrow) %v3018_v51, 8  ;;  %v1579_v29 = vrot.slane %v1578_v21, 2  ;;  %v1634_v31 = vrot.slane %v1633_v30, 4 }
 0x2be   : > { %v1580_v28 = vadd.f32 %v1579_v29, %v1578_v21  ;;  %v1635_v51 = vadd.f32 %v1634_v31, %v1633_v30 }
 0x2c0   : > { %1652 = vxpose.xlu0.b32.cont [11/16] (narrow) %v3024_v59, 8  ;;  %v1581_v55 = vrot.slane %v1580_v28, 1  ;;  %v1636_v59 = vrot.slane %v1635_v51, 2 }
 0x2c2   : > { %v1582_v33 = vadd.f32 %v1581_v55, %v1580_v28  ;;  %v1637_v34 = vadd.f32 %v1636_v59, %v1635_v51 }
 0x2c4   : > { %1653 = vxpose.xlu0.b32.cont [12/16] (narrow) %v3022_v57, 8  ;;  %v1583_v35 = vadd.f32 %v1582_v33, %v1544_v32 }
 0x2c6   : > { %1585 = vst.msk [vmem:[%s2603_s29] sm:$0x1] %vm1584_vm14, %v1583_v35 }
 0x2c7   : > { %2162 = shalt.err (!%p2159_p9)
}
 0x2c8   : > { %s2163_s29 = scalar_lea.hbm %s3127_s11, 16  ;;  %s2167_s14 = scalar_lea.hbm %s3273_s5, 32 }
 0x2c9   : > { %p2164_p10 = scmp.ne.s32.totalorder %s3127_s11, %s2163_s29  ;;  %p2168_p1 = scmp.lt.u32.totalorder %s3127_s11, %s3273_s5 }
 0x2ca   : > { %p2169_p3 = scmp.lt.u32.totalorder %s2167_s14, %s2163_s29  ;;  %p2171_p4 = scmp.lt.u32.totalorder %s2163_s29, %s3127_s11 }
 0x2cb   : > { %p2165_p11 = pnand %p2164_p10, %p2489_p12 }
 0x2cc   : > { %p2170_p2 = por %p2169_p3, %p2168_p1 }
 0x2cd   : > { %p2166_p0 = pneg %p2165_p11 }
 0x2ce   : > { %p2172_p6 = por %p2171_p4, %p2170_p2 }
 0x2d0   : > { %p2173_p8 = pnand %p2172_p6, %p2166_p0 }
 0x2d2   : > { %2176 = shalt.err (!%p2173_p8)
}
 0x2d3   : > { %2035 = dma.vmem_to_hbm [thread:$0]  (%p2489_p12), %s3129_s26, 16, %s3127_s11, %s1681_s17   ;;  %1654 = vxpose.xlu0.b32.cont [13/16] (narrow) %v3030_v63, 8  ;;  %v1638_v57 = vrot.slane %v1637_v34, 1  ;;  %v1586_v36 = vld [vmem:[%s2607_s18] sm:$0x1] }
 0x2d4   : > { %s1725_s10 = sshll.u32 %s2607_s18, 4  ;;  %s3166_s15 = scalar_lea.hbm %s3274_s6, %s1959_s24  ;;  %s1726_s10 = int_to_ptr.vmem [resolvable:$true] %s1725_s10 }
 0x2d5   : > { %v1639_v25 = vadd.f32 %v1638_v57, %v1637_v34  ;;  %s2177_s8 = scalar_lea.vmem %s1726_s10, 16  ;;  %s2340_s26 = smov [#allocation8]  }
 0x2d6   : > { %p2178_p9 = scmp.ne.s32.totalorder %s1726_s10, %s2177_s8  ;;  %s2181_s11 = sshll.u32 %s2340_s26, 4  ;;  %s2182_s11 = int_to_ptr.vmem [resolvable:$false] %s2181_s11 }
 0x2d7   : > { %1655 = vxpose.xlu0.b32.cont [14/16] (narrow) %v3028_v61, 8  ;;  %v1640_v37 = vadd.f32 %v1639_v25, %v1586_v36  ;;  %s2183_s29 = scalar_lea.vmem %s2182_s11, 32  ;;  %p2184_p0 = scmp.lt.s32.totalorder %s1726_s10, %s2182_s11 }
 0x2d8   : > { %p2179_p10 = pnand %p2178_p9, %p2489_p12  ;;  %p2185_p1 = scmp.lt.s32.totalorder %s2183_s29, %s2177_s8 }
 0x2d9   : > { %1641 = vst.msk [vmem:[%s2607_s18] sm:$0x1] %vm1584_vm14, %v1640_v37 }
 0x2da   : > { %p2180_p11 = pneg %p2179_p10  ;;  %p2186_p3 = por %p2185_p1, %p2184_p0 }
 0x2dc   : > { %p2187_p2 = pnand %p2186_p3, %p2180_p11 }
 0x2de   : > { %2190 = shalt.err (!%p2187_p2)
}
 0x2df   : > { %s2191_s18 = scalar_lea.hbm %s3166_s15, 16  ;;  %s2195_s13 = scalar_lea.hbm %s3274_s6, 32 }
 0x2e0   : > { %p2192_p4 = scmp.ne.s32.totalorder %s3166_s15, %s2191_s18  ;;  %p2196_p9 = scmp.lt.u32.totalorder %s3166_s15, %s3274_s6 }
 0x2e1   : > { %p2197_p10 = scmp.lt.u32.totalorder %s2195_s13, %s2191_s18  ;;  %p2199_p0 = scmp.lt.u32.totalorder %s2191_s18, %s3166_s15 }
 0x2e2   : > { %p2193_p6 = pnand %p2192_p4, %p2489_p12 }
 0x2e3   : > { %p2198_p11 = por %p2197_p10, %p2196_p9 }
 0x2e4   : > { %p2194_p8 = pneg %p2193_p6 }
 0x2e5   : > { %p2200_p1 = por %p2199_p0, %p2198_p11 }
 0x2e7   : > { %p2201_p3 = pnand %p2200_p1, %p2194_p8 }
 0x2e9   : > { %2204 = shalt.err (!%p2201_p3)
}
 0x2ea   : > { %2036 = dma.vmem_to_hbm [thread:$0]  (%p2489_p12), %s1726_s10, 16, %s3166_s15, %s1681_s17   ;;  %1656 = vxpose.xlu0.b32.cont [15/16] (narrow) %v3038_v3, 8 }
 0x2eb   : > { %s1957_s19 = sshll.u32 %s2315_s28, 1  ;;  %s1699_s8 = sshll.u32 %s367_s30, 4  ;;  %s3200_s8 = int_to_ptr.vmem [resolvable:$true] %s1699_s8 }
 0x2ec   : > { %s1692_s20 = sadd.s32 %s2311_s27, %s1957_s19  ;;  %s3312_s23 = sld [smem:[#allocation23_spill]] }
 0x2ed   : > { %s1958_s12 = sshll.u32 %s1692_s20, 7  ;;  %s3314_s17 = sand.u32 1, %s2303_s25  }
 0x2ee   : > { %1657 = vxpose.xlu0.b32.end [16/16] (narrow) %v3034_v1, 8  ;;  %s1676_s10 = scalar_lea.sflag [#allocation5], %s3314_s17  ;;  %s2205_s28 = scalar_lea.vmem %s3200_s8, 128 }
 0x2ef   : > { %p2206_p12 = scmp.ne.s32.totalorder %s3200_s8, %s2205_s28  ;;  %s2341_s27 = smov [#allocation4]  }
 0x2f0   : > { %s2209_s15 = sshll.u32 %s2341_s27, 4  ;;  %s2210_s15 = int_to_ptr.vmem [resolvable:$false] %s2209_s15 }
 0x2f1   : > { %p2207_p2 = pnand %p2206_p12, %p2454_p5  ;;  %s2211_s18 = scalar_lea.vmem %s2210_s15, 256 }
 0x2f2   : > { %s3313_s11 = smov %s3312_s23  ;;  %s3198_s29 = scalar_lea.hbm %s3312_s23, %s1958_s12 }
 0x2f3   : > { %p2208_p4 = pneg %p2207_p2  ;;  %p2212_p6 = scmp.lt.s32.totalorder %s3200_s8, %s2210_s15 }
 0x2f4   : > { %p2213_p8 = scmp.lt.s32.totalorder %s2211_s18, %s2205_s28 }
 0x2f6   : > { %p2214_p9 = por %p2213_p8, %p2212_p6 }
 0x2f8   : > { %p2215_p10 = pnand %p2214_p9, %p2208_p4 }
 0x332   : > { %v1658_v61 = vpop.trf.xlu0 }
 0x333   : > { %1674 = vst [vmem:[%s367_s30] sm:$0xff] %v1658_v61 }
 0x334   : > { %2218 = shalt.err (!%p2215_p10)
}
 0x335   : > { %s2219_s9 = scalar_lea.hbm %s3198_s29, 128  ;;  %s2223_s21 = scalar_lea.hbm %s3313_s11, 512 }
 0x336   : > { %p2220_p11 = scmp.ne.s32.totalorder %s3198_s29, %s2219_s9  ;;  %p2224_p3 = scmp.lt.u32.totalorder %s3198_s29, %s3313_s11 }
 0x337   : > { %p2225_p12 = scmp.lt.u32.totalorder %s2223_s21, %s2219_s9  ;;  %p2227_p4 = scmp.lt.u32.totalorder %s2219_s9, %s3198_s29 }
 0x338   : > { %p2221_p0 = pnand %p2220_p11, %p2454_p5 }
 0x339   : > { %p2226_p2 = por %p2225_p12, %p2224_p3 }
 0x33a   : > { %p2222_p1 = pneg %p2221_p0 }
 0x33b   : > { %p2228_p6 = por %p2227_p4, %p2226_p2 }
 0x33d   : > { %p2229_p8 = pnand %p2228_p6, %p2222_p1 }
 0x33f   : > { %2232 = shalt.err (!%p2229_p8)
}
 0x340   : > { %2034 = dma.vmem_to_hbm [thread:$0]  (%p2454_p5), %s3200_s8, 128, %s3198_s29, %s1676_s10  }
 0x341 PF: > { %s3315_s0 = sld [smem:[#allocation12_spill]]  ;;  %p2050_p9 = scmp.ge.s32.totalorder %s2327_s7, 2 }
 0x343   : > { %p2041_p10 = pnand %p2050_p9, %p2468_p7 }
 0x347   : > { %s1737_s20 = sand.u32 1, %s3315_s0  }
 0x348   : > { %s1738_s12 = scalar_lea.sflag [#allocation5], %s1737_s20 }
 0x349   : > { %2278 = dma.done.wait (!%p2041_p10), %s1738_s12, 128  }
 0x34a   : > { %2280 = vsyncadd (!%p2041_p10), %s1738_s12, 4294967168  ;;  %s3317_s4 = sadd.s32 4294967294, %s2327_s7   ;;  %p2044_p11 = pnand %p2050_p9, %p2495_p13 }
 0x34b   : > { %s1746_s23 = sand.u32 1, %s3317_s4  }
 0x34c   : > { %s1747_s16 = scalar_lea.sflag [#allocation7], %s1746_s23 }
 0x34d   : > { %2282 = dma.done.wait (!%p2044_p11), %s1747_s16, 32  }
 0x34e   : > { %2284 = vsyncadd (!%p2044_p11), %s1747_s16, 4294967264  ;;  %s23_s7 = sadd.s32 1, %s2327_s7   ;;  %s3319_s8 = sld [smem:[#allocation11_spill]] }
 0x34f   : > { %p20_p5 = scmp.ge.s32.totalorder %s23_s7, 6   ;;  %s3320_s23 = sld [smem:[#allocation19_spill]] }
 0x350   : > { %s3321_s29 = sld [smem:[#allocation13_spill]]  ;;  %s3322_s26 = sld [smem:[#allocation20_spill]] }
 0x351   : > { %s3323_s27 = sld [smem:[#allocation14_spill]]  ;;  %s3324_s28 = sld [smem:[#allocation15_spill]] }
 0x352   : > { %s3325_s17 = sld [smem:[#allocation16_spill]]  ;;  %s3326_s30 = sld [smem:[#allocation17_spill]] }
 0x353   : > { %s3327_s21 = smov %s2291_s22  ;;  %s3329_s24 = smov %s2303_s25 }
 0x354   : > { %s3328_s22 = smov %s3319_s8  ;;  %22 = sbr.rel (!%p20_p5) target bundleno = 12 (0xc), region = 124 }
 0x356   : > { %s3330_s25 = smov %s3321_s29 }
 0x358   : > { %s3331_s29 = smov %s3325_s17 }
 0x35b   :  { %1759 = vsyncpa [#allocation5], 1 }
 0x35c   :  { %1761 = vsyncpa [#allocation5 + $0x1], 1 }
 0x35d   :  { %1762 = vsyncpa [#allocation7], 1 }
 0x35e   :  { %1764 = vsyncpa [#allocation7 + $0x1], 1 }

</bundles_post_ra>
